<compile_context>
chip_gen: v6e
topology: v6e:2x2x1
jax: 0.10.0
libtpu: 0.0.40
codegen_flags: <defaults>
</compile_context>

<pallas_src>
import functools

import jax
import jax.numpy as jnp
from jax.experimental import pallas as pl
from jax.experimental.pallas import tpu as pltpu

_LN_EPS = 1e-5                 # torch.nn.LayerNorm default
_MM_DTYPE = jnp.bfloat16       # matmul operand dtype (accumulation stays f32)

_INNER_ROW_CAP = 512           # rows (= patches_per_step * num_words) per grid step
_ATTN_CHUNK_TARGET = 128       # target rows per in-kernel attention chunk
_VMEM_LIMIT = 48 * 1024 * 1024 # scoped VMEM (above 16/32 MiB defaults, < v7x 64 MiB)


# ----------------------------- in-kernel helpers -----------------------------

def _layernorm(x, gamma, beta):
    mu = jnp.mean(x, axis=-1, keepdims=True)
    var = jnp.mean(jnp.square(x - mu), axis=-1, keepdims=True)
    return (x - mu) * jax.lax.rsqrt(var + _LN_EPS) * gamma + beta


def _gelu(x):
    # tanh-form GELU (rides the EUP transcendental slot); deviation from the
    # exact erf GELU used by nn.GELU() is ~1e-3.
    c = 0.7978845608028654  # sqrt(2/pi)
    return 0.5 * x * (1.0 + jnp.tanh(c * (x + 0.044715 * x * x * x)))


def _dot(a, b):
    """a @ b (both already in matmul dtype), f32 accumulation on the MXU."""
    return jnp.dot(a, b, preferred_element_type=jnp.float32)


def _dot_nt(a, b):
    """a @ b.T (both already in matmul dtype), f32 accumulation on the MXU."""
    return jax.lax.dot_general(a, b, (((1,), (1,)), ((), ())),
                               preferred_element_type=jnp.float32)


def _group_bias(chunk, group):
    """Additive f32 bias (0 / -1e30) restricting attention to contiguous groups
    of `group` rows inside one chunk.  Built once per grid step."""
    ii = jax.lax.broadcasted_iota(jnp.int32, (chunk, chunk), 0)
    jj = jax.lax.broadcasted_iota(jnp.int32, (chunk, chunk), 1)
    if group & (group - 1) == 0:                      # power-of-two group
        m = ~(group - 1)
        same = (ii & m) == (jj & m)
    else:
        # Fallback: float floor-division; exact for the small chunk sizes used
        # here (chunk <= row cap << 2**20).
        inv = 1.0 / float(group)
        gi = jnp.floor((ii.astype(jnp.float32) + 0.5) * inv).astype(jnp.int32)
        gj = jnp.floor((jj.astype(jnp.float32) + 0.5) * inv).astype(jnp.int32)
        same = gi == gj
    return jnp.where(same, 0.0, -1e30).astype(jnp.float32)


def _grouped_mha(xn, wq, wk, wv, wp, bp, *, group, chunk, num_heads, scale):
    """Multi-head self-attention on a (rows, C) slab where softmax is restricted
    to contiguous groups of `group` rows.  QKV run on the full slab; the
    score/softmax/A@V stage is tiled into `chunk`-row pieces (chunk is a
    multiple of group, so groups never straddle a chunk)."""
    rows, C = xn.shape
    hd = C // num_heads
    xn_b = xn.astype(_MM_DTYPE)                      # cast once (not per matmul)
    q = _dot(xn_b, wq).astype(_MM_DTYPE)
    k = _dot(xn_b, wk).astype(_MM_DTYPE)
    v = _dot(xn_b, wv).astype(_MM_DTYPE)

    bias = None if chunk == group else _group_bias(chunk, group)
    n_chunks = rows // chunk
    outs = []
    for c in range(n_chunks):                        # static unroll, few chunks
        r = slice(c * chunk, (c + 1) * chunk)
        acc = jnp.zeros((chunk, C), jnp.float32)
        for h in range(num_heads):                   # static unroll over heads
            f = slice(h * hd, (h + 1) * hd)
            s = _dot_nt(q[r, f], k[r, f]) * scale    # (chunk, chunk)
            if bias is not None:
                s = s + bias
            s = s - jnp.max(s, axis=-1, keepdims=True)
            e = jnp.exp(s)
            p = (e * pl.reciprocal(jnp.sum(e, axis=-1, keepdims=True),
                                   approx=True)).astype(_MM_DTYPE)
            o_h = _dot(p, v[r, f]).astype(_MM_DTYPE)  # (chunk, hd)
            # per-head accumulation against row-slices of Wp: no narrow-lane
            # concatenate, full-C-lane accumulator.
            acc = acc + _dot(o_h, wp[f, :])
        outs.append(acc)
    out = outs[0] if n_chunks == 1 else jnp.concatenate(outs, axis=0)
    return out + bp


def _mlp(xn, w1, b1, w2, b2):
    h = _gelu(_dot(xn.astype(_MM_DTYPE), w1) + b1)
    return _dot(h.astype(_MM_DTYPE), w2) + b2


# --------------------------------- kernels -----------------------------------

def _inner_kernel(x_ref,
                  g1_ref, b1_ref, wq_ref, wk_ref, wv_ref, wp_ref, bp_ref,
                  g2_ref, b2_ref, w1_ref, bh_ref, w2_ref, bo_ref,
                  o_ref, *, group, chunk, num_heads, scale):
    """Fused inner transformer: x += MHA(LN(x)); x += MLP(LN(x)).
    x_ref is a (patches_per_step * num_words, inner_dim) slab; attention is
    local to each group of `num_words` rows and is evaluated chunk-by-chunk."""
    x = x_ref[...].astype(jnp.float32)
    xn = _layernorm(x, g1_ref[...], b1_ref[...])
    x = x + _grouped_mha(xn, wq_ref[...], wk_ref[...], wv_ref[...],
                         wp_ref[...], bp_ref[...],
                         group=group, chunk=chunk, num_heads=num_heads,
                         scale=scale)
    xn = _layernorm(x, g2_ref[...], b2_ref[...])
    x = x + _mlp(xn, w1_ref[...], bh_ref[...], w2_ref[...], bo_ref[...])
    o_ref[...] = x.astype(o_ref.dtype)


def _outer_kernel(xi_ref, xo_ref,
                  pg1_ref, pb1_ref, pw_ref, pg2_ref, pb2_ref,
                  g1_ref, b1_ref, wq_ref, wk_ref, wv_ref, wp_ref, bp_ref,
                  g2_ref, b2_ref, w1_ref, bh_ref, w2_ref, bo_ref,
                  o_ref, *, num_heads, scale):
    """Fused outer transformer for one batch element:
    x[1:] += LN2(proj(LN1(flattened inner words)));  (cls row untouched)
    x += MHA(LN(x)); x += MLP(LN(x)).
    xi_ref block is (1, N-1, num_words*inner_dim); xo_ref block is (1, N, Co)."""
    xi = xi_ref[0].astype(jnp.float32)               # (N-1, W*Ci)
    xo = xo_ref[0].astype(jnp.float32)               # (N, Co)
    n_seq, c_out = xo.shape
    p = _layernorm(
        _dot(_layernorm(xi, pg1_ref[...], pb1_ref[...]).astype(_MM_DTYPE),
             pw_ref[...]),
        pg2_ref[...], pb2_ref[...])                  # (N-1, Co)
    # class-token row (row 0) gets no projection contribution
    x = xo + jnp.concatenate([jnp.zeros((1, c_out), jnp.float32), p], axis=0)

    xn = _layernorm(x, g1_ref[...], b1_ref[...])
    x = x + _grouped_mha(xn, wq_ref[...], wk_ref[...], wv_ref[...],
                         wp_ref[...], bp_ref[...],
                         group=n_seq, chunk=n_seq,   # one sequence -> no mask
                         num_heads=num_heads, scale=scale)
    xn = _layernorm(x, g2_ref[...], b2_ref[...])
    x = x + _mlp(xn, w1_ref[...], bh_ref[...], w2_ref[...], bo_ref[...])
    o_ref[0] = x.astype(o_ref.dtype)


# -------------------------------- wrappers -----------------------------------

def _w(x):
    """Pre-cast a matmul weight to bf16 (halves the per-step weight DMA)."""
    return x.astype(_MM_DTYPE)


def _full_spec(arr):
    nd = arr.ndim
    return pl.BlockSpec(arr.shape, lambda i, _nd=nd: (0,) * _nd)


def _pick_patch_block(T, group, row_cap):
    """Patches per inner grid step: largest divisor of `T` whose row count is
    sublane-aligned and <= row_cap, preferring choices that leave >= 2 grid
    steps (so v7x's second TensorCore is used); full extent as a last resort."""
    best = None
    best_multi = None
    for d in range(1, T + 1):
        if T % d:
            continue
        rows = d * group
        if rows % 8 != 0 or rows > row_cap:
            continue
        best = d
        if T // d >= 2:
            best_multi = d
    if best_multi is not None:
        return best_multi
    if best is not None:
        return best
    return T                     # block == full array -> always legal


def _pick_chunk(n_groups, group, target):
    """Attention chunk (rows): largest multiple of `group` that divides the
    per-step group count, stays <= target, preferring sublane alignment."""
    cap = max(target, group)
    cands = [c for c in range(1, n_groups + 1)
             if n_groups % c == 0 and c * group <= cap]
    aligned = [c for c in cands if (c * group) % 8 == 0]
    return (max(aligned) if aligned else max(cands)) * group


def inner_transformer(inner_tokens, params, num_heads):
    T, W, C = inner_tokens.shape                  # T = B * num_patches
    PB = _pick_patch_block(T, W, _INNER_ROW_CAP)
    rows = PB * W
    chunk = _pick_chunk(PB, W, _ATTN_CHUNK_TARGET)
    x2d = inner_tokens.reshape(T * W, C)          # free reshape (row-major)

    g1, b1 = params["norm1"]
    g2, b2 = params["norm2"]
    a, m = params["attn"], params["mlp"]
    weights = (g1, b1,
               _w(a["wq"]), _w(a["wk"]), _w(a["wv"]), _w(a["wp"]), a["bp"],
               g2, b2,
               _w(m["w1"]), m["b1"], _w(m["w2"]), m["b2"])

    H = m["w1"].shape[1]
    R = T * W
    w_bytes = sum(int(w.size) * w.dtype.itemsize for w in weights)
    cost = pl.CostEstimate(
        flops=int(2 * R * C * (4 * C + 2 * H) + 4 * R * W * C),
        transcendentals=int(R * (W + H)),
        bytes_accessed=int(2 * R * C * 4 + w_bytes))

    kernel = functools.partial(_inner_kernel, group=W, chunk=chunk,
                               num_heads=num_heads,
                               scale=(C // num_heads) ** -0.5)
    out = pl.pallas_call(
        kernel,
        out_shape=jax.ShapeDtypeStruct((T * W, C), inner_tokens.dtype),
        grid=((T * W) // rows,),
        in_specs=[pl.BlockSpec((rows, C), lambda i: (i, 0))] +
                 [_full_spec(w) for w in weights],
        out_specs=pl.BlockSpec((rows, C), lambda i: (i, 0)),
        compiler_params=pltpu.CompilerParams(
            dimension_semantics=("parallel",),
            vmem_limit_bytes=_VMEM_LIMIT),
        cost_estimate=cost,
    )(x2d, *weights)
    return out.reshape(T, W, C)


def outer_transformer(inner_tokens, outer_tokens, proj_params, params, num_heads):
    B, N, Co = outer_tokens.shape
    T, W, Ci = inner_tokens.shape
    M = N - 1
    D = W * Ci

    # One feature row per patch; metadata-only reshape, no HBM pad.  The
    # 1-row class-token offset is handled inside the kernel.
    flat = inner_tokens.reshape(B, M, D)

    pg1, pb1 = proj_params["norm1"]
    pg2, pb2 = proj_params["norm2"]
    g1, b1 = params["norm1"]
    g2, b2 = params["norm2"]
    a, m = params["attn"], params["mlp"]
    weights = (pg1, pb1, _w(proj_params["w"]), pg2, pb2,
               g1, b1,
               _w(a["wq"]), _w(a["wk"]), _w(a["wv"]), _w(a["wp"]), a["bp"],
               g2, b2,
               _w(m["w1"]), m["b1"], _w(m["w2"]), m["b2"])

    H = m["w1"].shape[1]
    R = B * N
    w_bytes = sum(int(w.size) * w.dtype.itemsize for w in weights)
    cost = pl.CostEstimate(
        flops=int(2 * R * Co * (4 * Co + 2 * H) + 4 * R * N * Co
                  + 2 * B * M * D * Co),
        transcendentals=int(R * (N + H)),
        bytes_accessed=int(2 * R * Co * 4 + B * M * D * 4 + w_bytes))

    kernel = functools.partial(_outer_kernel, num_heads=num_heads,
                               scale=(Co // num_heads) ** -0.5)
    # Block the 3-D layout: block last-two dims equal the full array dims, so
    # the (8,128) rule holds for any N (e.g. the canonical 197) and the grid
    # has B parallel steps.  Weight specs are grid-invariant; not marking them
    # pl.Buffered(1) to stay conservative (double-buffering fits the budget).
    out = pl.pallas_call(
        kernel,
        out_shape=jax.ShapeDtypeStruct((B, N, Co), outer_tokens.dtype),
        grid=(B,),
        in_specs=[pl.BlockSpec((1, M, D), lambda b: (b, 0, 0)),
                  pl.BlockSpec((1, N, Co), lambda b: (b, 0, 0))] +
                 [_full_spec(w) for w in weights],
        out_specs=pl.BlockSpec((1, N, Co), lambda b: (b, 0, 0)),
        compiler_params=pltpu.CompilerParams(
            dimension_semantics=("parallel",),
            vmem_limit_bytes=_VMEM_LIMIT),
        cost_estimate=cost,
    )(flat, outer_tokens, *weights)
    return out


# ----------------------------- Block forward ---------------------------------

def tnt_block_forward(inner_tokens, outer_tokens, params, inner_heads, outer_heads):
    inner_tokens = inner_transformer(inner_tokens, params["inner"], inner_heads)
    outer_tokens = outer_transformer(inner_tokens, outer_tokens,
                                     params["proj"], params["outer"], outer_heads)
    return inner_tokens, outer_tokens


# ------------------------------- param init ----------------------------------

def init_block_params(key, outer_dim, inner_dim, num_words, mlp_ratio=4.0):
    def lin(k, fi, fo):
        return 0.02 * jax.random.normal(k, (fi, fo), jnp.float32)

    def ln(d):
        return (jnp.ones((1, d), jnp.float32), jnp.zeros((1, d), jnp.float32))

    ks = jax.random.split(key, 13)
    ih, oh = int(inner_dim * mlp_ratio), int(outer_dim * mlp_ratio)
    return {
        "inner": {
            "norm1": ln(inner_dim),
            # qk Linear(dim, 2*dim, bias=False) stored split: wq = cols [:dim], wk = cols [dim:]
            "attn": dict(wq=lin(ks[0], inner_dim, inner_dim),
                         wk=lin(ks[1], inner_dim, inner_dim),
                         wv=lin(ks[2], inner_dim, inner_dim),
                         wp=lin(ks[3], inner_dim, inner_dim),
                         bp=jnp.zeros((1, inner_dim), jnp.float32)),
            "norm2": ln(inner_dim),
            "mlp": dict(w1=lin(ks[4], inner_dim, ih), b1=jnp.zeros((1, ih), jnp.float32),
                        w2=lin(ks[5], ih, inner_dim), b2=jnp.zeros((1, inner_dim), jnp.float32)),
        },
        "proj": {
            "norm1": ln(num_words * inner_dim),
            "w": lin(ks[6], num_words * inner_dim, outer_dim),   # bias=False
            "norm2": ln(outer_dim),
        },
        "outer": {
            "norm1": ln(outer_dim),
            "attn": dict(wq=lin(ks[7], outer_dim, outer_dim),
                         wk=lin(ks[8], outer_dim, outer_dim),
                         wv=lin(ks[9], outer_dim, outer_dim),
                         wp=lin(ks[10], outer_dim, outer_dim),
                         bp=jnp.zeros((1, outer_dim), jnp.float32)),
            "norm2": ln(outer_dim),
            "mlp": dict(w1=lin(ks[11], outer_dim, oh), b1=jnp.zeros((1, oh), jnp.float32),
                        w2=lin(ks[12], oh, outer_dim), b2=jnp.zeros((1, outer_dim), jnp.float32)),
        },
    }


# ----------------------------- pure-JAX reference -----------------------------

def ref_block(inner_tokens, outer_tokens, params, inner_heads, outer_heads):
    def ln(x, gb):
        g, b = gb
        mu = x.mean(-1, keepdims=True)
        var = ((x - mu) ** 2).mean(-1, keepdims=True)
        return (x - mu) / jnp.sqrt(var + _LN_EPS) * g + b

    def attn(x, p, heads):
        Bn, N, C = x.shape
        hd = C // heads

        def split(w):
            return (x @ w).reshape(Bn, N, heads, hd).transpose(0, 2, 1, 3)

        q, k, v = split(p["wq"]), split(p["wk"]), split(p["wv"])
        s = jnp.einsum("bhqd,bhkd->bhqk", q, k) * (hd ** -0.5)
        a = jax.nn.softmax(s, axis=-1)
        o = jnp.einsum("bhqk,bhkd->bhqd", a, v).transpose(0, 2, 1, 3).reshape(Bn, N, C)
        return o @ p["wp"] + p["bp"]

    def mlp(x, p):
        return _gelu(x @ p["w1"] + p["b1"]) @ p["w2"] + p["b2"]

    pi, pp, po = params["inner"], params["proj"], params["outer"]
    it = inner_tokens
    it = it + attn(ln(it, pi["norm1"]), pi["attn"], inner_heads)
    it = it + mlp(ln(it, pi["norm2"]), pi["mlp"])

    B, N, _ = outer_tokens.shape
    flat = it.reshape(B, N - 1, -1)
    proj = ln(ln(flat, pp["norm1"]) @ pp["w"], pp["norm2"])
    ot = outer_tokens.at[:, 1:].add(proj)
    ot = ot + attn(ln(ot, po["norm1"]), po["attn"], outer_heads)
    ot = ot + mlp(ln(ot, po["norm2"]), po["mlp"])
    return it, ot


# ----------------------------------- main -------------------------------------

if __name__ == "__main__":
    B = 2
    num_patches = 4
    N_outer = num_patches + 1            # +1 class token
    num_words = 4
    inner_dim = 16
    outer_dim = 32
    inner_heads = 2
    outer_heads = 4

    key = jax.random.PRNGKey(0)
    k_in, k_out, k_par = jax.random.split(key, 3)

    inner_tokens = jax.random.normal(
        k_in, (B * num_patches, num_words, inner_dim), jnp.float32)
    outer_tokens = jax.random.normal(k_out, (B, N_outer, outer_dim), jnp.float32)
    params = init_block_params(k_par, outer_dim, inner_dim, num_words, mlp_ratio=4.0)

    fwd = jax.jit(functools.partial(tnt_block_forward,
                                    inner_heads=inner_heads,
                                    outer_heads=outer_heads))
    inner_out, outer_out = fwd(inner_tokens, outer_tokens, params)
    jax.block_until_ready((inner_out, outer_out))

    assert inner_out.shape == inner_tokens.shape
    assert outer_out.shape == outer_tokens.shape

    # numerical sanity check against a pure-JAX f32 reference (loose tolerance
    # accounts for bf16 matmul operands + approx reciprocal in the kernel)
    ref_i, ref_o = ref_block(inner_tokens, outer_tokens, params,
                             inner_heads, outer_heads)
    err_i = float(jnp.max(jnp.abs(inner_out - ref_i)))
    err_o = float(jnp.max(jnp.abs(outer_out - ref_o)))
    assert err_i < 5e-2 and err_o < 5e-2, (err_i, err_o)

    print("KERNEL_OK")
</pallas_src>

<mosaic_0001>
module attributes {stable_mosaic.version = 11 : i64} {
  func.func @_inner_kernel(%arg0: i32, %arg1: memref<16x16xf32, #tpu.memory_space<vmem>>, %arg2: memref<1x16xf32, #tpu.memory_space<vmem>>, %arg3: memref<1x16xf32, #tpu.memory_space<vmem>>, %arg4: memref<16x16xbf16, #tpu.memory_space<vmem>>, %arg5: memref<16x16xbf16, #tpu.memory_space<vmem>>, %arg6: memref<16x16xbf16, #tpu.memory_space<vmem>>, %arg7: memref<16x16xbf16, #tpu.memory_space<vmem>>, %arg8: memref<1x16xf32, #tpu.memory_space<vmem>>, %arg9: memref<1x16xf32, #tpu.memory_space<vmem>>, %arg10: memref<1x16xf32, #tpu.memory_space<vmem>>, %arg11: memref<16x64xbf16, #tpu.memory_space<vmem>>, %arg12: memref<1x64xf32, #tpu.memory_space<vmem>>, %arg13: memref<64x16xbf16, #tpu.memory_space<vmem>>, %arg14: memref<1x16xf32, #tpu.memory_space<vmem>>, %arg15: memref<16x16xf32, #tpu.memory_space<vmem>>) attributes {dimension_semantics = [#tpu.dimension_semantics<parallel>], iteration_bounds = array<i64: 2>, scalar_prefetch = 0 : i64, scratch_operands = 0 : i64, tpu.core_type = #tpu.core_type<tc>, window_params = [{transform_indices = @transform_0, window_bounds = array<i64: 16, 16>}, {pipeline_mode = #tpu.pipeline_mode<synchronous>, transform_indices = @transform_1, window_bounds = array<i64: 1, 16>}, {pipeline_mode = #tpu.pipeline_mode<synchronous>, transform_indices = @transform_2, window_bounds = array<i64: 1, 16>}, {pipeline_mode = #tpu.pipeline_mode<synchronous>, transform_indices = @transform_3, window_bounds = array<i64: 16, 16>}, {pipeline_mode = #tpu.pipeline_mode<synchronous>, transform_indices = @transform_4, window_bounds = array<i64: 16, 16>}, {pipeline_mode = #tpu.pipeline_mode<synchronous>, transform_indices = @transform_5, window_bounds = array<i64: 16, 16>}, {pipeline_mode = #tpu.pipeline_mode<synchronous>, transform_indices = @transform_6, window_bounds = array<i64: 16, 16>}, {pipeline_mode = #tpu.pipeline_mode<synchronous>, transform_indices = @transform_7, window_bounds = array<i64: 1, 16>}, {pipeline_mode = #tpu.pipeline_mode<synchronous>, transform_indices = @transform_8, window_bounds = array<i64: 1, 16>}, {pipeline_mode = #tpu.pipeline_mode<synchronous>, transform_indices = @transform_9, window_bounds = array<i64: 1, 16>}, {pipeline_mode = #tpu.pipeline_mode<synchronous>, transform_indices = @transform_10, window_bounds = array<i64: 16, 64>}, {pipeline_mode = #tpu.pipeline_mode<synchronous>, transform_indices = @transform_11, window_bounds = array<i64: 1, 64>}, {pipeline_mode = #tpu.pipeline_mode<synchronous>, transform_indices = @transform_12, window_bounds = array<i64: 64, 16>}, {pipeline_mode = #tpu.pipeline_mode<synchronous>, transform_indices = @transform_13, window_bounds = array<i64: 1, 16>}, {transform_indices = @transform_14, window_bounds = array<i64: 16, 16>}]} {
    %c0 = arith.constant 0 : index
    %c0_0 = arith.constant 0 : index
    %0 = vector.load %arg1[%c0, %c0_0] : memref<16x16xf32, #tpu.memory_space<vmem>>, vector<16x16xf32>
    %c0_1 = arith.constant 0 : index
    %c0_2 = arith.constant 0 : index
    %1 = vector.load %arg2[%c0_1, %c0_2] : memref<1x16xf32, #tpu.memory_space<vmem>>, vector<1x16xf32>
    %c0_3 = arith.constant 0 : index
    %c0_4 = arith.constant 0 : index
    %2 = vector.load %arg3[%c0_3, %c0_4] : memref<1x16xf32, #tpu.memory_space<vmem>>, vector<1x16xf32>
    %cst = arith.constant dense<0.000000e+00> : vector<16xf32>
    %3 = vector.multi_reduction <add>, %0, %cst [1] : vector<16x16xf32> to vector<16xf32>
    %4 = vector.shape_cast %3 : vector<16xf32> to vector<16x1xf32>
    %cst_5 = arith.constant 1.600000e+01 : f32
    %5 = vector.broadcast %cst_5 : f32 to vector<16x1xf32>
    %6 = arith.divf %4, %5 : vector<16x1xf32>
    %7 = vector.broadcast %6 : vector<16x1xf32> to vector<16x16xf32>
    %8 = arith.subf %0, %7 : vector<16x16xf32>
    %9 = arith.mulf %8, %8 : vector<16x16xf32>
    %cst_6 = arith.constant dense<0.000000e+00> : vector<16xf32>
    %10 = vector.multi_reduction <add>, %9, %cst_6 [1] : vector<16x16xf32> to vector<16xf32>
    %11 = vector.shape_cast %10 : vector<16xf32> to vector<16x1xf32>
    %cst_7 = arith.constant 1.600000e+01 : f32
    %12 = vector.broadcast %cst_7 : f32 to vector<16x1xf32>
    %13 = arith.divf %11, %12 : vector<16x1xf32>
    %14 = vector.broadcast %6 : vector<16x1xf32> to vector<16x16xf32>
    %15 = arith.subf %0, %14 : vector<16x16xf32>
    %cst_8 = arith.constant 9.99999974E-6 : f32
    %16 = vector.broadcast %cst_8 : f32 to vector<16x1xf32>
    %17 = arith.addf %13, %16 : vector<16x1xf32>
    %18 = math.rsqrt %17 : vector<16x1xf32>
    %19 = vector.broadcast %18 : vector<16x1xf32> to vector<16x16xf32>
    %20 = arith.mulf %15, %19 : vector<16x16xf32>
    %21 = vector.broadcast %1 : vector<1x16xf32> to vector<16x16xf32>
    %22 = arith.mulf %20, %21 : vector<16x16xf32>
    %23 = vector.broadcast %2 : vector<1x16xf32> to vector<16x16xf32>
    %24 = arith.addf %22, %23 : vector<16x16xf32>
    %c0_9 = arith.constant 0 : index
    %c0_10 = arith.constant 0 : index
    %25 = vector.load %arg4[%c0_9, %c0_10] : memref<16x16xbf16, #tpu.memory_space<vmem>>, vector<16x16xbf16>
    %c0_11 = arith.constant 0 : index
    %c0_12 = arith.constant 0 : index
    %26 = vector.load %arg5[%c0_11, %c0_12] : memref<16x16xbf16, #tpu.memory_space<vmem>>, vector<16x16xbf16>
    %c0_13 = arith.constant 0 : index
    %c0_14 = arith.constant 0 : index
    %27 = vector.load %arg6[%c0_13, %c0_14] : memref<16x16xbf16, #tpu.memory_space<vmem>>, vector<16x16xbf16>
    %c0_15 = arith.constant 0 : index
    %c0_16 = arith.constant 0 : index
    %28 = vector.load %arg7[%c0_15, %c0_16] : memref<16x16xbf16, #tpu.memory_space<vmem>>, vector<16x16xbf16>
    %c0_17 = arith.constant 0 : index
    %c0_18 = arith.constant 0 : index
    %29 = vector.load %arg8[%c0_17, %c0_18] : memref<1x16xf32, #tpu.memory_space<vmem>>, vector<1x16xf32>
    %30 = arith.truncf %24 : vector<16x16xf32> to vector<16x16xbf16>
    %cst_19 = arith.constant dense<0.000000e+00> : vector<16x16xf32>
    %31 = tpu.matmul %30, %25, %cst_19 {dimension_numbers = #tpu.dot_dimension_numbers<[1], [0], [0], [1], [0, 0, 1, 1], [], []>} : vector<16x16xbf16>, vector<16x16xbf16>, vector<16x16xf32> -> vector<16x16xf32>
    %32 = arith.truncf %31 : vector<16x16xf32> to vector<16x16xbf16>
    %cst_20 = arith.constant dense<0.000000e+00> : vector<16x16xf32>
    %33 = tpu.matmul %30, %26, %cst_20 {dimension_numbers = #tpu.dot_dimension_numbers<[1], [0], [0], [1], [0, 0, 1, 1], [], []>} : vector<16x16xbf16>, vector<16x16xbf16>, vector<16x16xf32> -> vector<16x16xf32>
    %34 = arith.truncf %33 : vector<16x16xf32> to vector<16x16xbf16>
    %cst_21 = arith.constant dense<0.000000e+00> : vector<16x16xf32>
    %35 = tpu.matmul %30, %27, %cst_21 {dimension_numbers = #tpu.dot_dimension_numbers<[1], [0], [0], [1], [0, 0, 1, 1], [], []>} : vector<16x16xbf16>, vector<16x16xbf16>, vector<16x16xf32> -> vector<16x16xf32>
    %36 = arith.truncf %35 : vector<16x16xf32> to vector<16x16xbf16>
    %37 = tpu.iota {dimensions = array<i32: 0>} : vector<16x16xi32>
    %38 = tpu.iota {dimensions = array<i32: 1>} : vector<16x16xi32>
    %c-4_i32 = arith.constant -4 : i32
    %39 = vector.broadcast %c-4_i32 : i32 to vector<16x16xi32>
    %40 = arith.andi %37, %39 : vector<16x16xi32>
    %c-4_i32_22 = arith.constant -4 : i32
    %41 = vector.broadcast %c-4_i32_22 : i32 to vector<16x16xi32>
    %42 = arith.andi %38, %41 : vector<16x16xi32>
    %43 = arith.cmpi eq, %40, %42 : vector<16x16xi32>
    %cst_23 = arith.constant 0.000000e+00 : f32
    %cst_24 = arith.constant -1.000000e+30 : f32
    %44 = vector.broadcast %cst_23 : f32 to vector<16x16xf32>
    %45 = vector.broadcast %cst_24 : f32 to vector<16x16xf32>
    %46 = arith.select %43, %44, %45 : vector<16x16xi1>, vector<16x16xf32>
    %cst_25 = arith.constant 0.000000e+00 : f32
    %47 = vector.broadcast %cst_25 : f32 to vector<16x16xf32>
    %48 = vector.extract_strided_slice %32 {offsets = [0, 0], sizes = [16, 8], strides = [1, 1]} : vector<16x16xbf16> to vector<16x8xbf16>
    %49 = vector.extract_strided_slice %34 {offsets = [0, 0], sizes = [16, 8], strides = [1, 1]} : vector<16x16xbf16> to vector<16x8xbf16>
    %cst_26 = arith.constant dense<0.000000e+00> : vector<16x16xf32>
    %50 = tpu.matmul %48, %49, %cst_26 {dimension_numbers = #tpu.dot_dimension_numbers<[1], [1], [0], [0], [0, 0, 1, 0], [], []>} : vector<16x8xbf16>, vector<16x8xbf16>, vector<16x16xf32> -> vector<16x16xf32>
    %cst_27 = arith.constant 0.353553385 : f32
    %51 = vector.broadcast %cst_27 : f32 to vector<16x16xf32>
    %52 = arith.mulf %50, %51 : vector<16x16xf32>
    %53 = arith.addf %52, %46 : vector<16x16xf32>
    %cst_28 = arith.constant dense<0xFF800000> : vector<16xf32>
    %54 = vector.multi_reduction <maximumf>, %53, %cst_28 [1] : vector<16x16xf32> to vector<16xf32>
    %55 = vector.shape_cast %54 : vector<16xf32> to vector<16x1xf32>
    %56 = vector.broadcast %55 : vector<16x1xf32> to vector<16x16xf32>
    %57 = arith.subf %53, %56 : vector<16x16xf32>
    %58 = math.exp %57 : vector<16x16xf32>
    %cst_29 = arith.constant dense<0.000000e+00> : vector<16xf32>
    %59 = vector.multi_reduction <add>, %58, %cst_29 [1] : vector<16x16xf32> to vector<16xf32>
    %60 = vector.shape_cast %59 : vector<16xf32> to vector<16x1xf32>
    %61 = tpu.reciprocal %60 {approx = true} : vector<16x1xf32> -> vector<16x1xf32>
    %62 = vector.broadcast %61 : vector<16x1xf32> to vector<16x16xf32>
    %63 = arith.mulf %58, %62 : vector<16x16xf32>
    %64 = arith.truncf %63 : vector<16x16xf32> to vector<16x16xbf16>
    %65 = vector.extract_strided_slice %36 {offsets = [0, 0], sizes = [16, 8], strides = [1, 1]} : vector<16x16xbf16> to vector<16x8xbf16>
    %cst_30 = arith.constant dense<0.000000e+00> : vector<16x8xf32>
    %66 = tpu.matmul %64, %65, %cst_30 {dimension_numbers = #tpu.dot_dimension_numbers<[1], [0], [0], [1], [0, 0, 1, 1], [], []>} : vector<16x16xbf16>, vector<16x8xbf16>, vector<16x8xf32> -> vector<16x8xf32>
    %67 = arith.truncf %66 : vector<16x8xf32> to vector<16x8xbf16>
    %68 = vector.extract_strided_slice %28 {offsets = [0, 0], sizes = [8, 16], strides = [1, 1]} : vector<16x16xbf16> to vector<8x16xbf16>
    %cst_31 = arith.constant dense<0.000000e+00> : vector<16x16xf32>
    %69 = tpu.matmul %67, %68, %cst_31 {dimension_numbers = #tpu.dot_dimension_numbers<[1], [0], [0], [1], [0, 0, 1, 1], [], []>} : vector<16x8xbf16>, vector<8x16xbf16>, vector<16x16xf32> -> vector<16x16xf32>
    %70 = arith.addf %47, %69 : vector<16x16xf32>
    %71 = vector.extract_strided_slice %32 {offsets = [0, 8], sizes = [16, 8], strides = [1, 1]} : vector<16x16xbf16> to vector<16x8xbf16>
    %72 = vector.extract_strided_slice %34 {offsets = [0, 8], sizes = [16, 8], strides = [1, 1]} : vector<16x16xbf16> to vector<16x8xbf16>
    %cst_32 = arith.constant dense<0.000000e+00> : vector<16x16xf32>
    %73 = tpu.matmul %71, %72, %cst_32 {dimension_numbers = #tpu.dot_dimension_numbers<[1], [1], [0], [0], [0, 0, 1, 0], [], []>} : vector<16x8xbf16>, vector<16x8xbf16>, vector<16x16xf32> -> vector<16x16xf32>
    %cst_33 = arith.constant 0.353553385 : f32
    %74 = vector.broadcast %cst_33 : f32 to vector<16x16xf32>
    %75 = arith.mulf %73, %74 : vector<16x16xf32>
    %76 = arith.addf %75, %46 : vector<16x16xf32>
    %cst_34 = arith.constant dense<0xFF800000> : vector<16xf32>
    %77 = vector.multi_reduction <maximumf>, %76, %cst_34 [1] : vector<16x16xf32> to vector<16xf32>
    %78 = vector.shape_cast %77 : vector<16xf32> to vector<16x1xf32>
    %79 = vector.broadcast %78 : vector<16x1xf32> to vector<16x16xf32>
    %80 = arith.subf %76, %79 : vector<16x16xf32>
    %81 = math.exp %80 : vector<16x16xf32>
    %cst_35 = arith.constant dense<0.000000e+00> : vector<16xf32>
    %82 = vector.multi_reduction <add>, %81, %cst_35 [1] : vector<16x16xf32> to vector<16xf32>
    %83 = vector.shape_cast %82 : vector<16xf32> to vector<16x1xf32>
    %84 = tpu.reciprocal %83 {approx = true} : vector<16x1xf32> -> vector<16x1xf32>
    %85 = vector.broadcast %84 : vector<16x1xf32> to vector<16x16xf32>
    %86 = arith.mulf %81, %85 : vector<16x16xf32>
    %87 = arith.truncf %86 : vector<16x16xf32> to vector<16x16xbf16>
    %88 = vector.extract_strided_slice %36 {offsets = [0, 8], sizes = [16, 8], strides = [1, 1]} : vector<16x16xbf16> to vector<16x8xbf16>
    %cst_36 = arith.constant dense<0.000000e+00> : vector<16x8xf32>
    %89 = tpu.matmul %87, %88, %cst_36 {dimension_numbers = #tpu.dot_dimension_numbers<[1], [0], [0], [1], [0, 0, 1, 1], [], []>} : vector<16x16xbf16>, vector<16x8xbf16>, vector<16x8xf32> -> vector<16x8xf32>
    %90 = arith.truncf %89 : vector<16x8xf32> to vector<16x8xbf16>
    %91 = vector.extract_strided_slice %28 {offsets = [8, 0], sizes = [8, 16], strides = [1, 1]} : vector<16x16xbf16> to vector<8x16xbf16>
    %cst_37 = arith.constant dense<0.000000e+00> : vector<16x16xf32>
    %92 = tpu.matmul %90, %91, %cst_37 {dimension_numbers = #tpu.dot_dimension_numbers<[1], [0], [0], [1], [0, 0, 1, 1], [], []>} : vector<16x8xbf16>, vector<8x16xbf16>, vector<16x16xf32> -> vector<16x16xf32>
    %93 = arith.addf %70, %92 : vector<16x16xf32>
    %94 = vector.broadcast %29 : vector<1x16xf32> to vector<16x16xf32>
    %95 = arith.addf %93, %94 : vector<16x16xf32>
    %96 = arith.addf %0, %95 : vector<16x16xf32>
    %c0_38 = arith.constant 0 : index
    %c0_39 = arith.constant 0 : index
    %97 = vector.load %arg9[%c0_38, %c0_39] : memref<1x16xf32, #tpu.memory_space<vmem>>, vector<1x16xf32>
    %c0_40 = arith.constant 0 : index
    %c0_41 = arith.constant 0 : index
    %98 = vector.load %arg10[%c0_40, %c0_41] : memref<1x16xf32, #tpu.memory_space<vmem>>, vector<1x16xf32>
    %cst_42 = arith.constant dense<0.000000e+00> : vector<16xf32>
    %99 = vector.multi_reduction <add>, %96, %cst_42 [1] : vector<16x16xf32> to vector<16xf32>
    %100 = vector.shape_cast %99 : vector<16xf32> to vector<16x1xf32>
    %cst_43 = arith.constant 1.600000e+01 : f32
    %101 = vector.broadcast %cst_43 : f32 to vector<16x1xf32>
    %102 = arith.divf %100, %101 : vector<16x1xf32>
    %103 = vector.broadcast %102 : vector<16x1xf32> to vector<16x16xf32>
    %104 = arith.subf %96, %103 : vector<16x16xf32>
    %105 = arith.mulf %104, %104 : vector<16x16xf32>
    %cst_44 = arith.constant dense<0.000000e+00> : vector<16xf32>
    %106 = vector.multi_reduction <add>, %105, %cst_44 [1] : vector<16x16xf32> to vector<16xf32>
    %107 = vector.shape_cast %106 : vector<16xf32> to vector<16x1xf32>
    %cst_45 = arith.constant 1.600000e+01 : f32
    %108 = vector.broadcast %cst_45 : f32 to vector<16x1xf32>
    %109 = arith.divf %107, %108 : vector<16x1xf32>
    %110 = vector.broadcast %102 : vector<16x1xf32> to vector<16x16xf32>
    %111 = arith.subf %96, %110 : vector<16x16xf32>
    %cst_46 = arith.constant 9.99999974E-6 : f32
    %112 = vector.broadcast %cst_46 : f32 to vector<16x1xf32>
    %113 = arith.addf %109, %112 : vector<16x1xf32>
    %114 = math.rsqrt %113 : vector<16x1xf32>
    %115 = vector.broadcast %114 : vector<16x1xf32> to vector<16x16xf32>
    %116 = arith.mulf %111, %115 : vector<16x16xf32>
    %117 = vector.broadcast %97 : vector<1x16xf32> to vector<16x16xf32>
    %118 = arith.mulf %116, %117 : vector<16x16xf32>
    %119 = vector.broadcast %98 : vector<1x16xf32> to vector<16x16xf32>
    %120 = arith.addf %118, %119 : vector<16x16xf32>
    %c0_47 = arith.constant 0 : index
    %c0_48 = arith.constant 0 : index
    %121 = vector.load %arg11[%c0_47, %c0_48] : memref<16x64xbf16, #tpu.memory_space<vmem>>, vector<16x64xbf16>
    %c0_49 = arith.constant 0 : index
    %c0_50 = arith.constant 0 : index
    %122 = vector.load %arg12[%c0_49, %c0_50] : memref<1x64xf32, #tpu.memory_space<vmem>>, vector<1x64xf32>
    %c0_51 = arith.constant 0 : index
    %c0_52 = arith.constant 0 : index
    %123 = vector.load %arg13[%c0_51, %c0_52] : memref<64x16xbf16, #tpu.memory_space<vmem>>, vector<64x16xbf16>
    %c0_53 = arith.constant 0 : index
    %c0_54 = arith.constant 0 : index
    %124 = vector.load %arg14[%c0_53, %c0_54] : memref<1x16xf32, #tpu.memory_space<vmem>>, vector<1x16xf32>
    %125 = arith.truncf %120 : vector<16x16xf32> to vector<16x16xbf16>
    %cst_55 = arith.constant dense<0.000000e+00> : vector<16x64xf32>
    %126 = tpu.matmul %125, %121, %cst_55 {dimension_numbers = #tpu.dot_dimension_numbers<[1], [0], [0], [1], [0, 0, 1, 1], [], []>} : vector<16x16xbf16>, vector<16x64xbf16>, vector<16x64xf32> -> vector<16x64xf32>
    %127 = vector.broadcast %122 : vector<1x64xf32> to vector<16x64xf32>
    %128 = arith.addf %126, %127 : vector<16x64xf32>
    %cst_56 = arith.constant 5.000000e-01 : f32
    %129 = vector.broadcast %cst_56 : f32 to vector<16x64xf32>
    %130 = arith.mulf %129, %128 : vector<16x64xf32>
    %cst_57 = arith.constant 4.471500e-02 : f32
    %131 = vector.broadcast %cst_57 : f32 to vector<16x64xf32>
    %132 = arith.mulf %131, %128 : vector<16x64xf32>
    %133 = arith.mulf %132, %128 : vector<16x64xf32>
    %134 = arith.mulf %133, %128 : vector<16x64xf32>
    %135 = arith.addf %128, %134 : vector<16x64xf32>
    %cst_58 = arith.constant 0.797884583 : f32
    %136 = vector.broadcast %cst_58 : f32 to vector<16x64xf32>
    %137 = arith.mulf %136, %135 : vector<16x64xf32>
    %138 = math.tanh %137 : vector<16x64xf32>
    %cst_59 = arith.constant 1.000000e+00 : f32
    %139 = vector.broadcast %cst_59 : f32 to vector<16x64xf32>
    %140 = arith.addf %139, %138 : vector<16x64xf32>
    %141 = arith.mulf %130, %140 : vector<16x64xf32>
    %142 = arith.truncf %141 : vector<16x64xf32> to vector<16x64xbf16>
    %cst_60 = arith.constant dense<0.000000e+00> : vector<16x16xf32>
    %143 = tpu.matmul %142, %123, %cst_60 {dimension_numbers = #tpu.dot_dimension_numbers<[1], [0], [0], [1], [0, 0, 1, 1], [], []>} : vector<16x64xbf16>, vector<64x16xbf16>, vector<16x16xf32> -> vector<16x16xf32>
    %144 = vector.broadcast %124 : vector<1x16xf32> to vector<16x16xf32>
    %145 = arith.addf %143, %144 : vector<16x16xf32>
    %146 = arith.addf %96, %145 : vector<16x16xf32>
    %c0_61 = arith.constant 0 : index
    %c0_62 = arith.constant 0 : index
    %147 = vector.load %arg15[%c0_61, %c0_62] : memref<16x16xf32, #tpu.memory_space<vmem>>, vector<16x16xf32>
    tpu.vector_store %arg15[%c0_61, %c0_62], %146 {strides = array<i32>} : memref<16x16xf32, #tpu.memory_space<vmem>>, vector<16x16xf32>,
    return
  }
  func.func @transform_0(%arg0: i32) -> (i32, i32) {
    %c0_i32 = arith.constant 0 : i32
    %c0_i32_0 = arith.constant 0 : i32
    return %arg0, %c0_i32 : i32, i32
  }
  func.func @transform_1(%arg0: i32) -> (i32, i32) {
    %c0_i32 = arith.constant 0 : i32
    %c0_i32_0 = arith.constant 0 : i32
    %c0_i32_1 = arith.constant 0 : i32
    return %c0_i32, %c0_i32_0 : i32, i32
  }
  func.func @transform_2(%arg0: i32) -> (i32, i32) {
    %c0_i32 = arith.constant 0 : i32
    %c0_i32_0 = arith.constant 0 : i32
    %c0_i32_1 = arith.constant 0 : i32
    return %c0_i32, %c0_i32_0 : i32, i32
  }
  func.func @transform_3(%arg0: i32) -> (i32, i32) {
    %c0_i32 = arith.constant 0 : i32
    %c0_i32_0 = arith.constant 0 : i32
    %c0_i32_1 = arith.constant 0 : i32
    return %c0_i32, %c0_i32_0 : i32, i32
  }
  func.func @transform_4(%arg0: i32) -> (i32, i32) {
    %c0_i32 = arith.constant 0 : i32
    %c0_i32_0 = arith.constant 0 : i32
    %c0_i32_1 = arith.constant 0 : i32
    return %c0_i32, %c0_i32_0 : i32, i32
  }
  func.func @transform_5(%arg0: i32) -> (i32, i32) {
    %c0_i32 = arith.constant 0 : i32
    %c0_i32_0 = arith.constant 0 : i32
    %c0_i32_1 = arith.constant 0 : i32
    return %c0_i32, %c0_i32_0 : i32, i32
  }
  func.func @transform_6(%arg0: i32) -> (i32, i32) {
    %c0_i32 = arith.constant 0 : i32
    %c0_i32_0 = arith.constant 0 : i32
    %c0_i32_1 = arith.constant 0 : i32
    return %c0_i32, %c0_i32_0 : i32, i32
  }
  func.func @transform_7(%arg0: i32) -> (i32, i32) {
    %c0_i32 = arith.constant 0 : i32
    %c0_i32_0 = arith.constant 0 : i32
    %c0_i32_1 = arith.constant 0 : i32
    return %c0_i32, %c0_i32_0 : i32, i32
  }
  func.func @transform_8(%arg0: i32) -> (i32, i32) {
    %c0_i32 = arith.constant 0 : i32
    %c0_i32_0 = arith.constant 0 : i32
    %c0_i32_1 = arith.constant 0 : i32
    return %c0_i32, %c0_i32_0 : i32, i32
  }
  func.func @transform_9(%arg0: i32) -> (i32, i32) {
    %c0_i32 = arith.constant 0 : i32
    %c0_i32_0 = arith.constant 0 : i32
    %c0_i32_1 = arith.constant 0 : i32
    return %c0_i32, %c0_i32_0 : i32, i32
  }
  func.func @transform_10(%arg0: i32) -> (i32, i32) {
    %c0_i32 = arith.constant 0 : i32
    %c0_i32_0 = arith.constant 0 : i32
    %c0_i32_1 = arith.constant 0 : i32
    return %c0_i32, %c0_i32_0 : i32, i32
  }
  func.func @transform_11(%arg0: i32) -> (i32, i32) {
    %c0_i32 = arith.constant 0 : i32
    %c0_i32_0 = arith.constant 0 : i32
    %c0_i32_1 = arith.constant 0 : i32
    return %c0_i32, %c0_i32_0 : i32, i32
  }
  func.func @transform_12(%arg0: i32) -> (i32, i32) {
    %c0_i32 = arith.constant 0 : i32
    %c0_i32_0 = arith.constant 0 : i32
    %c0_i32_1 = arith.constant 0 : i32
    return %c0_i32, %c0_i32_0 : i32, i32
  }
  func.func @transform_13(%arg0: i32) -> (i32, i32) {
    %c0_i32 = arith.constant 0 : i32
    %c0_i32_0 = arith.constant 0 : i32
    %c0_i32_1 = arith.constant 0 : i32
    return %c0_i32, %c0_i32_0 : i32, i32
  }
  func.func @transform_14(%arg0: i32) -> (i32, i32) {
    %c0_i32 = arith.constant 0 : i32
    %c0_i32_0 = arith.constant 0 : i32
    return %arg0, %c0_i32 : i32, i32
  }
}

module attributes {stable_mosaic.version = 11 : i64} {
  func.func @_outer_kernel(%arg0: i32, %arg1: memref<1x4x64xf32, #tpu.memory_space<vmem>>, %arg2: memref<1x5x32xf32, #tpu.memory_space<vmem>>, %arg3: memref<1x64xf32, #tpu.memory_space<vmem>>, %arg4: memref<1x64xf32, #tpu.memory_space<vmem>>, %arg5: memref<64x32xbf16, #tpu.memory_space<vmem>>, %arg6: memref<1x32xf32, #tpu.memory_space<vmem>>, %arg7: memref<1x32xf32, #tpu.memory_space<vmem>>, %arg8: memref<1x32xf32, #tpu.memory_space<vmem>>, %arg9: memref<1x32xf32, #tpu.memory_space<vmem>>, %arg10: memref<32x32xbf16, #tpu.memory_space<vmem>>, %arg11: memref<32x32xbf16, #tpu.memory_space<vmem>>, %arg12: memref<32x32xbf16, #tpu.memory_space<vmem>>, %arg13: memref<32x32xbf16, #tpu.memory_space<vmem>>, %arg14: memref<1x32xf32, #tpu.memory_space<vmem>>, %arg15: memref<1x32xf32, #tpu.memory_space<vmem>>, %arg16: memref<1x32xf32, #tpu.memory_space<vmem>>, %arg17: memref<32x128xbf16, #tpu.memory_space<vmem>>, %arg18: memref<1x128xf32, #tpu.memory_space<vmem>>, %arg19: memref<128x32xbf16, #tpu.memory_space<vmem>>, %arg20: memref<1x32xf32, #tpu.memory_space<vmem>>, %arg21: memref<1x5x32xf32, #tpu.memory_space<vmem>>) attributes {dimension_semantics = [#tpu.dimension_semantics<parallel>], iteration_bounds = array<i64: 2>, scalar_prefetch = 0 : i64, scratch_operands = 0 : i64, tpu.core_type = #tpu.core_type<tc>, window_params = [{transform_indices = @transform_0, window_bounds = array<i64: 1, 4, 64>}, {transform_indices = @transform_1, window_bounds = array<i64: 1, 5, 32>}, {pipeline_mode = #tpu.pipeline_mode<synchronous>, transform_indices = @transform_2, window_bounds = array<i64: 1, 64>}, {pipeline_mode = #tpu.pipeline_mode<synchronous>, transform_indices = @transform_3, window_bounds = array<i64: 1, 64>}, {pipeline_mode = #tpu.pipeline_mode<synchronous>, transform_indices = @transform_4, window_bounds = array<i64: 64, 32>}, {pipeline_mode = #tpu.pipeline_mode<synchronous>, transform_indices = @transform_5, window_bounds = array<i64: 1, 32>}, {pipeline_mode = #tpu.pipeline_mode<synchronous>, transform_indices = @transform_6, window_bounds = array<i64: 1, 32>}, {pipeline_mode = #tpu.pipeline_mode<synchronous>, transform_indices = @transform_7, window_bounds = array<i64: 1, 32>}, {pipeline_mode = #tpu.pipeline_mode<synchronous>, transform_indices = @transform_8, window_bounds = array<i64: 1, 32>}, {pipeline_mode = #tpu.pipeline_mode<synchronous>, transform_indices = @transform_9, window_bounds = array<i64: 32, 32>}, {pipeline_mode = #tpu.pipeline_mode<synchronous>, transform_indices = @transform_10, window_bounds = array<i64: 32, 32>}, {pipeline_mode = #tpu.pipeline_mode<synchronous>, transform_indices = @transform_11, window_bounds = array<i64: 32, 32>}, {pipeline_mode = #tpu.pipeline_mode<synchronous>, transform_indices = @transform_12, window_bounds = array<i64: 32, 32>}, {pipeline_mode = #tpu.pipeline_mode<synchronous>, transform_indices = @transform_13, window_bounds = array<i64: 1, 32>}, {pipeline_mode = #tpu.pipeline_mode<synchronous>, transform_indices = @transform_14, window_bounds = array<i64: 1, 32>}, {pipeline_mode = #tpu.pipeline_mode<synchronous>, transform_indices = @transform_15, window_bounds = array<i64: 1, 32>}, {pipeline_mode = #tpu.pipeline_mode<synchronous>, transform_indices = @transform_16, window_bounds = array<i64: 32, 128>}, {pipeline_mode = #tpu.pipeline_mode<synchronous>, transform_indices = @transform_17, window_bounds = array<i64: 1, 128>}, {pipeline_mode = #tpu.pipeline_mode<synchronous>, transform_indices = @transform_18, window_bounds = array<i64: 128, 32>}, {pipeline_mode = #tpu.pipeline_mode<synchronous>, transform_indices = @transform_19, window_bounds = array<i64: 1, 32>}, {transform_indices = @transform_20, window_bounds = array<i64: 1, 5, 32>}]} {
    %c0 = arith.constant 0 : index
    %c0_0 = arith.constant 0 : index
    %c0_1 = arith.constant 0 : index
    %0 = vector.load %arg1[%c0, %c0_0, %c0_1] : memref<1x4x64xf32, #tpu.memory_space<vmem>>, vector<1x4x64xf32>
    %1 = vector.shape_cast %0 : vector<1x4x64xf32> to vector<4x64xf32>
    %c0_2 = arith.constant 0 : index
    %c0_3 = arith.constant 0 : index
    %c0_4 = arith.constant 0 : index
    %2 = vector.load %arg2[%c0_2, %c0_3, %c0_4] : memref<1x5x32xf32, #tpu.memory_space<vmem>>, vector<1x5x32xf32>
    %3 = vector.shape_cast %2 : vector<1x5x32xf32> to vector<5x32xf32>
    %c0_5 = arith.constant 0 : index
    %c0_6 = arith.constant 0 : index
    %4 = vector.load %arg3[%c0_5, %c0_6] : memref<1x64xf32, #tpu.memory_space<vmem>>, vector<1x64xf32>
    %c0_7 = arith.constant 0 : index
    %c0_8 = arith.constant 0 : index
    %5 = vector.load %arg4[%c0_7, %c0_8] : memref<1x64xf32, #tpu.memory_space<vmem>>, vector<1x64xf32>
    %cst = arith.constant dense<0.000000e+00> : vector<4xf32>
    %6 = vector.multi_reduction <add>, %1, %cst [1] : vector<4x64xf32> to vector<4xf32>
    %7 = vector.shape_cast %6 : vector<4xf32> to vector<4x1xf32>
    %cst_9 = arith.constant 6.400000e+01 : f32
    %8 = vector.broadcast %cst_9 : f32 to vector<4x1xf32>
    %9 = arith.divf %7, %8 : vector<4x1xf32>
    %10 = vector.broadcast %9 : vector<4x1xf32> to vector<4x64xf32>
    %11 = arith.subf %1, %10 : vector<4x64xf32>
    %12 = arith.mulf %11, %11 : vector<4x64xf32>
    %cst_10 = arith.constant dense<0.000000e+00> : vector<4xf32>
    %13 = vector.multi_reduction <add>, %12, %cst_10 [1] : vector<4x64xf32> to vector<4xf32>
    %14 = vector.shape_cast %13 : vector<4xf32> to vector<4x1xf32>
    %cst_11 = arith.constant 6.400000e+01 : f32
    %15 = vector.broadcast %cst_11 : f32 to vector<4x1xf32>
    %16 = arith.divf %14, %15 : vector<4x1xf32>
    %17 = vector.broadcast %9 : vector<4x1xf32> to vector<4x64xf32>
    %18 = arith.subf %1, %17 : vector<4x64xf32>
    %cst_12 = arith.constant 9.99999974E-6 : f32
    %19 = vector.broadcast %cst_12 : f32 to vector<4x1xf32>
    %20 = arith.addf %16, %19 : vector<4x1xf32>
    %21 = math.rsqrt %20 : vector<4x1xf32>
    %22 = vector.broadcast %21 : vector<4x1xf32> to vector<4x64xf32>
    %23 = arith.mulf %18, %22 : vector<4x64xf32>
    %24 = vector.broadcast %4 : vector<1x64xf32> to vector<4x64xf32>
    %25 = arith.mulf %23, %24 : vector<4x64xf32>
    %26 = vector.broadcast %5 : vector<1x64xf32> to vector<4x64xf32>
    %27 = arith.addf %25, %26 : vector<4x64xf32>
    %28 = arith.truncf %27 : vector<4x64xf32> to vector<4x64xbf16>
    %c0_13 = arith.constant 0 : index
    %c0_14 = arith.constant 0 : index
    %29 = vector.load %arg5[%c0_13, %c0_14] : memref<64x32xbf16, #tpu.memory_space<vmem>>, vector<64x32xbf16>
    %cst_15 = arith.constant dense<0.000000e+00> : vector<4x32xf32>
    %30 = tpu.matmul %28, %29, %cst_15 {dimension_numbers = #tpu.dot_dimension_numbers<[1], [0], [0], [1], [0, 0, 1, 1], [], []>} : vector<4x64xbf16>, vector<64x32xbf16>, vector<4x32xf32> -> vector<4x32xf32>
    %c0_16 = arith.constant 0 : index
    %c0_17 = arith.constant 0 : index
    %31 = vector.load %arg6[%c0_16, %c0_17] : memref<1x32xf32, #tpu.memory_space<vmem>>, vector<1x32xf32>
    %c0_18 = arith.constant 0 : index
    %c0_19 = arith.constant 0 : index
    %32 = vector.load %arg7[%c0_18, %c0_19] : memref<1x32xf32, #tpu.memory_space<vmem>>, vector<1x32xf32>
    %cst_20 = arith.constant dense<0.000000e+00> : vector<4xf32>
    %33 = vector.multi_reduction <add>, %30, %cst_20 [1] : vector<4x32xf32> to vector<4xf32>
    %34 = vector.shape_cast %33 : vector<4xf32> to vector<4x1xf32>
    %cst_21 = arith.constant 3.200000e+01 : f32
    %35 = vector.broadcast %cst_21 : f32 to vector<4x1xf32>
    %36 = arith.divf %34, %35 : vector<4x1xf32>
    %37 = vector.broadcast %36 : vector<4x1xf32> to vector<4x32xf32>
    %38 = arith.subf %30, %37 : vector<4x32xf32>
    %39 = arith.mulf %38, %38 : vector<4x32xf32>
    %cst_22 = arith.constant dense<0.000000e+00> : vector<4xf32>
    %40 = vector.multi_reduction <add>, %39, %cst_22 [1] : vector<4x32xf32> to vector<4xf32>
    %41 = vector.shape_cast %40 : vector<4xf32> to vector<4x1xf32>
    %cst_23 = arith.constant 3.200000e+01 : f32
    %42 = vector.broadcast %cst_23 : f32 to vector<4x1xf32>
    %43 = arith.divf %41, %42 : vector<4x1xf32>
    %44 = vector.broadcast %36 : vector<4x1xf32> to vector<4x32xf32>
    %45 = arith.subf %30, %44 : vector<4x32xf32>
    %cst_24 = arith.constant 9.99999974E-6 : f32
    %46 = vector.broadcast %cst_24 : f32 to vector<4x1xf32>
    %47 = arith.addf %43, %46 : vector<4x1xf32>
    %48 = math.rsqrt %47 : vector<4x1xf32>
    %49 = vector.broadcast %48 : vector<4x1xf32> to vector<4x32xf32>
    %50 = arith.mulf %45, %49 : vector<4x32xf32>
    %51 = vector.broadcast %31 : vector<1x32xf32> to vector<4x32xf32>
    %52 = arith.mulf %50, %51 : vector<4x32xf32>
    %53 = vector.broadcast %32 : vector<1x32xf32> to vector<4x32xf32>
    %54 = arith.addf %52, %53 : vector<4x32xf32>
    %cst_25 = arith.constant 0.000000e+00 : f32
    %55 = vector.broadcast %cst_25 : f32 to vector<1x32xf32>
    %56 = tpu.concatenate %55, %54 in 0 : vector<1x32xf32>, vector<4x32xf32> -> vector<5x32xf32>
    %57 = arith.addf %3, %56 : vector<5x32xf32>
    %c0_26 = arith.constant 0 : index
    %c0_27 = arith.constant 0 : index
    %58 = vector.load %arg8[%c0_26, %c0_27] : memref<1x32xf32, #tpu.memory_space<vmem>>, vector<1x32xf32>
    %c0_28 = arith.constant 0 : index
    %c0_29 = arith.constant 0 : index
    %59 = vector.load %arg9[%c0_28, %c0_29] : memref<1x32xf32, #tpu.memory_space<vmem>>, vector<1x32xf32>
    %cst_30 = arith.constant dense<0.000000e+00> : vector<5xf32>
    %60 = vector.multi_reduction <add>, %57, %cst_30 [1] : vector<5x32xf32> to vector<5xf32>
    %61 = vector.shape_cast %60 : vector<5xf32> to vector<5x1xf32>
    %cst_31 = arith.constant 3.200000e+01 : f32
    %62 = vector.broadcast %cst_31 : f32 to vector<5x1xf32>
    %63 = arith.divf %61, %62 : vector<5x1xf32>
    %64 = vector.broadcast %63 : vector<5x1xf32> to vector<5x32xf32>
    %65 = arith.subf %57, %64 : vector<5x32xf32>
    %66 = arith.mulf %65, %65 : vector<5x32xf32>
    %cst_32 = arith.constant dense<0.000000e+00> : vector<5xf32>
    %67 = vector.multi_reduction <add>, %66, %cst_32 [1] : vector<5x32xf32> to vector<5xf32>
    %68 = vector.shape_cast %67 : vector<5xf32> to vector<5x1xf32>
    %cst_33 = arith.constant 3.200000e+01 : f32
    %69 = vector.broadcast %cst_33 : f32 to vector<5x1xf32>
    %70 = arith.divf %68, %69 : vector<5x1xf32>
    %71 = vector.broadcast %63 : vector<5x1xf32> to vector<5x32xf32>
    %72 = arith.subf %57, %71 : vector<5x32xf32>
    %cst_34 = arith.constant 9.99999974E-6 : f32
    %73 = vector.broadcast %cst_34 : f32 to vector<5x1xf32>
    %74 = arith.addf %70, %73 : vector<5x1xf32>
    %75 = math.rsqrt %74 : vector<5x1xf32>
    %76 = vector.broadcast %75 : vector<5x1xf32> to vector<5x32xf32>
    %77 = arith.mulf %72, %76 : vector<5x32xf32>
    %78 = vector.broadcast %58 : vector<1x32xf32> to vector<5x32xf32>
    %79 = arith.mulf %77, %78 : vector<5x32xf32>
    %80 = vector.broadcast %59 : vector<1x32xf32> to vector<5x32xf32>
    %81 = arith.addf %79, %80 : vector<5x32xf32>
    %c0_35 = arith.constant 0 : index
    %c0_36 = arith.constant 0 : index
    %82 = vector.load %arg10[%c0_35, %c0_36] : memref<32x32xbf16, #tpu.memory_space<vmem>>, vector<32x32xbf16>
    %c0_37 = arith.constant 0 : index
    %c0_38 = arith.constant 0 : index
    %83 = vector.load %arg11[%c0_37, %c0_38] : memref<32x32xbf16, #tpu.memory_space<vmem>>, vector<32x32xbf16>
    %c0_39 = arith.constant 0 : index
    %c0_40 = arith.constant 0 : index
    %84 = vector.load %arg12[%c0_39, %c0_40] : memref<32x32xbf16, #tpu.memory_space<vmem>>, vector<32x32xbf16>
    %c0_41 = arith.constant 0 : index
    %c0_42 = arith.constant 0 : index
    %85 = vector.load %arg13[%c0_41, %c0_42] : memref<32x32xbf16, #tpu.memory_space<vmem>>, vector<32x32xbf16>
    %c0_43 = arith.constant 0 : index
    %c0_44 = arith.constant 0 : index
    %86 = vector.load %arg14[%c0_43, %c0_44] : memref<1x32xf32, #tpu.memory_space<vmem>>, vector<1x32xf32>
    %87 = arith.truncf %81 : vector<5x32xf32> to vector<5x32xbf16>
    %cst_45 = arith.constant dense<0.000000e+00> : vector<5x32xf32>
    %88 = tpu.matmul %87, %82, %cst_45 {dimension_numbers = #tpu.dot_dimension_numbers<[1], [0], [0], [1], [0, 0, 1, 1], [], []>} : vector<5x32xbf16>, vector<32x32xbf16>, vector<5x32xf32> -> vector<5x32xf32>
    %89 = arith.truncf %88 : vector<5x32xf32> to vector<5x32xbf16>
    %cst_46 = arith.constant dense<0.000000e+00> : vector<5x32xf32>
    %90 = tpu.matmul %87, %83, %cst_46 {dimension_numbers = #tpu.dot_dimension_numbers<[1], [0], [0], [1], [0, 0, 1, 1], [], []>} : vector<5x32xbf16>, vector<32x32xbf16>, vector<5x32xf32> -> vector<5x32xf32>
    %91 = arith.truncf %90 : vector<5x32xf32> to vector<5x32xbf16>
    %cst_47 = arith.constant dense<0.000000e+00> : vector<5x32xf32>
    %92 = tpu.matmul %87, %84, %cst_47 {dimension_numbers = #tpu.dot_dimension_numbers<[1], [0], [0], [1], [0, 0, 1, 1], [], []>} : vector<5x32xbf16>, vector<32x32xbf16>, vector<5x32xf32> -> vector<5x32xf32>
    %93 = arith.truncf %92 : vector<5x32xf32> to vector<5x32xbf16>
    %cst_48 = arith.constant 0.000000e+00 : f32
    %94 = vector.broadcast %cst_48 : f32 to vector<5x32xf32>
    %95 = vector.extract_strided_slice %89 {offsets = [0, 0], sizes = [5, 8], strides = [1, 1]} : vector<5x32xbf16> to vector<5x8xbf16>
    %96 = vector.extract_strided_slice %91 {offsets = [0, 0], sizes = [5, 8], strides = [1, 1]} : vector<5x32xbf16> to vector<5x8xbf16>
    %cst_49 = arith.constant dense<0.000000e+00> : vector<5x5xf32>
    %97 = tpu.matmul %95, %96, %cst_49 {dimension_numbers = #tpu.dot_dimension_numbers<[1], [1], [0], [0], [0, 0, 1, 0], [], []>} : vector<5x8xbf16>, vector<5x8xbf16>, vector<5x5xf32> -> vector<5x5xf32>
    %cst_50 = arith.constant 0.353553385 : f32
    %98 = vector.broadcast %cst_50 : f32 to vector<5x5xf32>
    %99 = arith.mulf %97, %98 : vector<5x5xf32>
    %cst_51 = arith.constant dense<0xFF800000> : vector<5xf32>
    %100 = vector.multi_reduction <maximumf>, %99, %cst_51 [1] : vector<5x5xf32> to vector<5xf32>
    %101 = vector.shape_cast %100 : vector<5xf32> to vector<5x1xf32>
    %102 = vector.broadcast %101 : vector<5x1xf32> to vector<5x5xf32>
    %103 = arith.subf %99, %102 : vector<5x5xf32>
    %104 = math.exp %103 : vector<5x5xf32>
    %cst_52 = arith.constant dense<0.000000e+00> : vector<5xf32>
    %105 = vector.multi_reduction <add>, %104, %cst_52 [1] : vector<5x5xf32> to vector<5xf32>
    %106 = vector.shape_cast %105 : vector<5xf32> to vector<5x1xf32>
    %107 = tpu.reciprocal %106 {approx = true} : vector<5x1xf32> -> vector<5x1xf32>
    %108 = vector.broadcast %107 : vector<5x1xf32> to vector<5x5xf32>
    %109 = arith.mulf %104, %108 : vector<5x5xf32>
    %110 = arith.truncf %109 : vector<5x5xf32> to vector<5x5xbf16>
    %111 = vector.extract_strided_slice %93 {offsets = [0, 0], sizes = [5, 8], strides = [1, 1]} : vector<5x32xbf16> to vector<5x8xbf16>
    %cst_53 = arith.constant dense<0.000000e+00> : vector<5x8xf32>
    %112 = tpu.matmul %110, %111, %cst_53 {dimension_numbers = #tpu.dot_dimension_numbers<[1], [0], [0], [1], [0, 0, 1, 1], [], []>} : vector<5x5xbf16>, vector<5x8xbf16>, vector<5x8xf32> -> vector<5x8xf32>
    %113 = arith.truncf %112 : vector<5x8xf32> to vector<5x8xbf16>
    %114 = vector.extract_strided_slice %85 {offsets = [0, 0], sizes = [8, 32], strides = [1, 1]} : vector<32x32xbf16> to vector<8x32xbf16>
    %cst_54 = arith.constant dense<0.000000e+00> : vector<5x32xf32>
    %115 = tpu.matmul %113, %114, %cst_54 {dimension_numbers = #tpu.dot_dimension_numbers<[1], [0], [0], [1], [0, 0, 1, 1], [], []>} : vector<5x8xbf16>, vector<8x32xbf16>, vector<5x32xf32> -> vector<5x32xf32>
    %116 = arith.addf %94, %115 : vector<5x32xf32>
    %117 = vector.extract_strided_slice %89 {offsets = [0, 8], sizes = [5, 8], strides = [1, 1]} : vector<5x32xbf16> to vector<5x8xbf16>
    %118 = vector.extract_strided_slice %91 {offsets = [0, 8], sizes = [5, 8], strides = [1, 1]} : vector<5x32xbf16> to vector<5x8xbf16>
    %cst_55 = arith.constant dense<0.000000e+00> : vector<5x5xf32>
    %119 = tpu.matmul %117, %118, %cst_55 {dimension_numbers = #tpu.dot_dimension_numbers<[1], [1], [0], [0], [0, 0, 1, 0], [], []>} : vector<5x8xbf16>, vector<5x8xbf16>, vector<5x5xf32> -> vector<5x5xf32>
    %cst_56 = arith.constant 0.353553385 : f32
    %120 = vector.broadcast %cst_56 : f32 to vector<5x5xf32>
    %121 = arith.mulf %119, %120 : vector<5x5xf32>
    %cst_57 = arith.constant dense<0xFF800000> : vector<5xf32>
    %122 = vector.multi_reduction <maximumf>, %121, %cst_57 [1] : vector<5x5xf32> to vector<5xf32>
    %123 = vector.shape_cast %122 : vector<5xf32> to vector<5x1xf32>
    %124 = vector.broadcast %123 : vector<5x1xf32> to vector<5x5xf32>
    %125 = arith.subf %121, %124 : vector<5x5xf32>
    %126 = math.exp %125 : vector<5x5xf32>
    %cst_58 = arith.constant dense<0.000000e+00> : vector<5xf32>
    %127 = vector.multi_reduction <add>, %126, %cst_58 [1] : vector<5x5xf32> to vector<5xf32>
    %128 = vector.shape_cast %127 : vector<5xf32> to vector<5x1xf32>
    %129 = tpu.reciprocal %128 {approx = true} : vector<5x1xf32> -> vector<5x1xf32>
    %130 = vector.broadcast %129 : vector<5x1xf32> to vector<5x5xf32>
    %131 = arith.mulf %126, %130 : vector<5x5xf32>
    %132 = arith.truncf %131 : vector<5x5xf32> to vector<5x5xbf16>
    %133 = vector.extract_strided_slice %93 {offsets = [0, 8], sizes = [5, 8], strides = [1, 1]} : vector<5x32xbf16> to vector<5x8xbf16>
    %cst_59 = arith.constant dense<0.000000e+00> : vector<5x8xf32>
    %134 = tpu.matmul %132, %133, %cst_59 {dimension_numbers = #tpu.dot_dimension_numbers<[1], [0], [0], [1], [0, 0, 1, 1], [], []>} : vector<5x5xbf16>, vector<5x8xbf16>, vector<5x8xf32> -> vector<5x8xf32>
    %135 = arith.truncf %134 : vector<5x8xf32> to vector<5x8xbf16>
    %136 = vector.extract_strided_slice %85 {offsets = [8, 0], sizes = [8, 32], strides = [1, 1]} : vector<32x32xbf16> to vector<8x32xbf16>
    %cst_60 = arith.constant dense<0.000000e+00> : vector<5x32xf32>
    %137 = tpu.matmul %135, %136, %cst_60 {dimension_numbers = #tpu.dot_dimension_numbers<[1], [0], [0], [1], [0, 0, 1, 1], [], []>} : vector<5x8xbf16>, vector<8x32xbf16>, vector<5x32xf32> -> vector<5x32xf32>
    %138 = arith.addf %116, %137 : vector<5x32xf32>
    %139 = vector.extract_strided_slice %89 {offsets = [0, 16], sizes = [5, 8], strides = [1, 1]} : vector<5x32xbf16> to vector<5x8xbf16>
    %140 = vector.extract_strided_slice %91 {offsets = [0, 16], sizes = [5, 8], strides = [1, 1]} : vector<5x32xbf16> to vector<5x8xbf16>
    %cst_61 = arith.constant dense<0.000000e+00> : vector<5x5xf32>
    %141 = tpu.matmul %139, %140, %cst_61 {dimension_numbers = #tpu.dot_dimension_numbers<[1], [1], [0], [0], [0, 0, 1, 0], [], []>} : vector<5x8xbf16>, vector<5x8xbf16>, vector<5x5xf32> -> vector<5x5xf32>
    %cst_62 = arith.constant 0.353553385 : f32
    %142 = vector.broadcast %cst_62 : f32 to vector<5x5xf32>
    %143 = arith.mulf %141, %142 : vector<5x5xf32>
    %cst_63 = arith.constant dense<0xFF800000> : vector<5xf32>
    %144 = vector.multi_reduction <maximumf>, %143, %cst_63 [1] : vector<5x5xf32> to vector<5xf32>
    %145 = vector.shape_cast %144 : vector<5xf32> to vector<5x1xf32>
    %146 = vector.broadcast %145 : vector<5x1xf32> to vector<5x5xf32>
    %147 = arith.subf %143, %146 : vector<5x5xf32>
    %148 = math.exp %147 : vector<5x5xf32>
    %cst_64 = arith.constant dense<0.000000e+00> : vector<5xf32>
    %149 = vector.multi_reduction <add>, %148, %cst_64 [1] : vector<5x5xf32> to vector<5xf32>
    %150 = vector.shape_cast %149 : vector<5xf32> to vector<5x1xf32>
    %151 = tpu.reciprocal %150 {approx = true} : vector<5x1xf32> -> vector<5x1xf32>
    %152 = vector.broadcast %151 : vector<5x1xf32> to vector<5x5xf32>
    %153 = arith.mulf %148, %152 : vector<5x5xf32>
    %154 = arith.truncf %153 : vector<5x5xf32> to vector<5x5xbf16>
    %155 = vector.extract_strided_slice %93 {offsets = [0, 16], sizes = [5, 8], strides = [1, 1]} : vector<5x32xbf16> to vector<5x8xbf16>
    %cst_65 = arith.constant dense<0.000000e+00> : vector<5x8xf32>
    %156 = tpu.matmul %154, %155, %cst_65 {dimension_numbers = #tpu.dot_dimension_numbers<[1], [0], [0], [1], [0, 0, 1, 1], [], []>} : vector<5x5xbf16>, vector<5x8xbf16>, vector<5x8xf32> -> vector<5x8xf32>
    %157 = arith.truncf %156 : vector<5x8xf32> to vector<5x8xbf16>
    %158 = vector.extract_strided_slice %85 {offsets = [16, 0], sizes = [8, 32], strides = [1, 1]} : vector<32x32xbf16> to vector<8x32xbf16>
    %cst_66 = arith.constant dense<0.000000e+00> : vector<5x32xf32>
    %159 = tpu.matmul %157, %158, %cst_66 {dimension_numbers = #tpu.dot_dimension_numbers<[1], [0], [0], [1], [0, 0, 1, 1], [], []>} : vector<5x8xbf16>, vector<8x32xbf16>, vector<5x32xf32> -> vector<5x32xf32>
    %160 = arith.addf %138, %159 : vector<5x32xf32>
    %161 = vector.extract_strided_slice %89 {offsets = [0, 24], sizes = [5, 8], strides = [1, 1]} : vector<5x32xbf16> to vector<5x8xbf16>
    %162 = vector.extract_strided_slice %91 {offsets = [0, 24], sizes = [5, 8], strides = [1, 1]} : vector<5x32xbf16> to vector<5x8xbf16>
    %cst_67 = arith.constant dense<0.000000e+00> : vector<5x5xf32>
    %163 = tpu.matmul %161, %162, %cst_67 {dimension_numbers = #tpu.dot_dimension_numbers<[1], [1], [0], [0], [0, 0, 1, 0], [], []>} : vector<5x8xbf16>, vector<5x8xbf16>, vector<5x5xf32> -> vector<5x5xf32>
    %cst_68 = arith.constant 0.353553385 : f32
    %164 = vector.broadcast %cst_68 : f32 to vector<5x5xf32>
    %165 = arith.mulf %163, %164 : vector<5x5xf32>
    %cst_69 = arith.constant dense<0xFF800000> : vector<5xf32>
    %166 = vector.multi_reduction <maximumf>, %165, %cst_69 [1] : vector<5x5xf32> to vector<5xf32>
    %167 = vector.shape_cast %166 : vector<5xf32> to vector<5x1xf32>
    %168 = vector.broadcast %167 : vector<5x1xf32> to vector<5x5xf32>
    %169 = arith.subf %165, %168 : vector<5x5xf32>
    %170 = math.exp %169 : vector<5x5xf32>
    %cst_70 = arith.constant dense<0.000000e+00> : vector<5xf32>
    %171 = vector.multi_reduction <add>, %170, %cst_70 [1] : vector<5x5xf32> to vector<5xf32>
    %172 = vector.shape_cast %171 : vector<5xf32> to vector<5x1xf32>
    %173 = tpu.reciprocal %172 {approx = true} : vector<5x1xf32> -> vector<5x1xf32>
    %174 = vector.broadcast %173 : vector<5x1xf32> to vector<5x5xf32>
    %175 = arith.mulf %170, %174 : vector<5x5xf32>
    %176 = arith.truncf %175 : vector<5x5xf32> to vector<5x5xbf16>
    %177 = vector.extract_strided_slice %93 {offsets = [0, 24], sizes = [5, 8], strides = [1, 1]} : vector<5x32xbf16> to vector<5x8xbf16>
    %cst_71 = arith.constant dense<0.000000e+00> : vector<5x8xf32>
    %178 = tpu.matmul %176, %177, %cst_71 {dimension_numbers = #tpu.dot_dimension_numbers<[1], [0], [0], [1], [0, 0, 1, 1], [], []>} : vector<5x5xbf16>, vector<5x8xbf16>, vector<5x8xf32> -> vector<5x8xf32>
    %179 = arith.truncf %178 : vector<5x8xf32> to vector<5x8xbf16>
    %180 = vector.extract_strided_slice %85 {offsets = [24, 0], sizes = [8, 32], strides = [1, 1]} : vector<32x32xbf16> to vector<8x32xbf16>
    %cst_72 = arith.constant dense<0.000000e+00> : vector<5x32xf32>
    %181 = tpu.matmul %179, %180, %cst_72 {dimension_numbers = #tpu.dot_dimension_numbers<[1], [0], [0], [1], [0, 0, 1, 1], [], []>} : vector<5x8xbf16>, vector<8x32xbf16>, vector<5x32xf32> -> vector<5x32xf32>
    %182 = arith.addf %160, %181 : vector<5x32xf32>
    %183 = vector.broadcast %86 : vector<1x32xf32> to vector<5x32xf32>
    %184 = arith.addf %182, %183 : vector<5x32xf32>
    %185 = arith.addf %57, %184 : vector<5x32xf32>
    %c0_73 = arith.constant 0 : index
    %c0_74 = arith.constant 0 : index
    %186 = vector.load %arg15[%c0_73, %c0_74] : memref<1x32xf32, #tpu.memory_space<vmem>>, vector<1x32xf32>
    %c0_75 = arith.constant 0 : index
    %c0_76 = arith.constant 0 : index
    %187 = vector.load %arg16[%c0_75, %c0_76] : memref<1x32xf32, #tpu.memory_space<vmem>>, vector<1x32xf32>
    %cst_77 = arith.constant dense<0.000000e+00> : vector<5xf32>
    %188 = vector.multi_reduction <add>, %185, %cst_77 [1] : vector<5x32xf32> to vector<5xf32>
    %189 = vector.shape_cast %188 : vector<5xf32> to vector<5x1xf32>
    %cst_78 = arith.constant 3.200000e+01 : f32
    %190 = vector.broadcast %cst_78 : f32 to vector<5x1xf32>
    %191 = arith.divf %189, %190 : vector<5x1xf32>
    %192 = vector.broadcast %191 : vector<5x1xf32> to vector<5x32xf32>
    %193 = arith.subf %185, %192 : vector<5x32xf32>
    %194 = arith.mulf %193, %193 : vector<5x32xf32>
    %cst_79 = arith.constant dense<0.000000e+00> : vector<5xf32>
    %195 = vector.multi_reduction <add>, %194, %cst_79 [1] : vector<5x32xf32> to vector<5xf32>
    %196 = vector.shape_cast %195 : vector<5xf32> to vector<5x1xf32>
    %cst_80 = arith.constant 3.200000e+01 : f32
    %197 = vector.broadcast %cst_80 : f32 to vector<5x1xf32>
    %198 = arith.divf %196, %197 : vector<5x1xf32>
    %199 = vector.broadcast %191 : vector<5x1xf32> to vector<5x32xf32>
    %200 = arith.subf %185, %199 : vector<5x32xf32>
    %cst_81 = arith.constant 9.99999974E-6 : f32
    %201 = vector.broadcast %cst_81 : f32 to vector<5x1xf32>
    %202 = arith.addf %198, %201 : vector<5x1xf32>
    %203 = math.rsqrt %202 : vector<5x1xf32>
    %204 = vector.broadcast %203 : vector<5x1xf32> to vector<5x32xf32>
    %205 = arith.mulf %200, %204 : vector<5x32xf32>
    %206 = vector.broadcast %186 : vector<1x32xf32> to vector<5x32xf32>
    %207 = arith.mulf %205, %206 : vector<5x32xf32>
    %208 = vector.broadcast %187 : vector<1x32xf32> to vector<5x32xf32>
    %209 = arith.addf %207, %208 : vector<5x32xf32>
    %c0_82 = arith.constant 0 : index
    %c0_83 = arith.constant 0 : index
    %210 = vector.load %arg17[%c0_82, %c0_83] : memref<32x128xbf16, #tpu.memory_space<vmem>>, vector<32x128xbf16>
    %c0_84 = arith.constant 0 : index
    %c0_85 = arith.constant 0 : index
    %211 = vector.load %arg18[%c0_84, %c0_85] : memref<1x128xf32, #tpu.memory_space<vmem>>, vector<1x128xf32>
    %c0_86 = arith.constant 0 : index
    %c0_87 = arith.constant 0 : index
    %212 = vector.load %arg19[%c0_86, %c0_87] : memref<128x32xbf16, #tpu.memory_space<vmem>>, vector<128x32xbf16>
    %c0_88 = arith.constant 0 : index
    %c0_89 = arith.constant 0 : index
    %213 = vector.load %arg20[%c0_88, %c0_89] : memref<1x32xf32, #tpu.memory_space<vmem>>, vector<1x32xf32>
    %214 = arith.truncf %209 : vector<5x32xf32> to vector<5x32xbf16>
    %cst_90 = arith.constant dense<0.000000e+00> : vector<5x128xf32>
    %215 = tpu.matmul %214, %210, %cst_90 {dimension_numbers = #tpu.dot_dimension_numbers<[1], [0], [0], [1], [0, 0, 1, 1], [], []>} : vector<5x32xbf16>, vector<32x128xbf16>, vector<5x128xf32> -> vector<5x128xf32>
    %216 = vector.broadcast %211 : vector<1x128xf32> to vector<5x128xf32>
    %217 = arith.addf %215, %216 : vector<5x128xf32>
    %cst_91 = arith.constant 5.000000e-01 : f32
    %218 = vector.broadcast %cst_91 : f32 to vector<5x128xf32>
    %219 = arith.mulf %218, %217 : vector<5x128xf32>
    %cst_92 = arith.constant 4.471500e-02 : f32
    %220 = vector.broadcast %cst_92 : f32 to vector<5x128xf32>
    %221 = arith.mulf %220, %217 : vector<5x128xf32>
    %222 = arith.mulf %221, %217 : vector<5x128xf32>
    %223 = arith.mulf %222, %217 : vector<5x128xf32>
    %224 = arith.addf %217, %223 : vector<5x128xf32>
    %cst_93 = arith.constant 0.797884583 : f32
    %225 = vector.broadcast %cst_93 : f32 to vector<5x128xf32>
    %226 = arith.mulf %225, %224 : vector<5x128xf32>
    %227 = math.tanh %226 : vector<5x128xf32>
    %cst_94 = arith.constant 1.000000e+00 : f32
    %228 = vector.broadcast %cst_94 : f32 to vector<5x128xf32>
    %229 = arith.addf %228, %227 : vector<5x128xf32>
    %230 = arith.mulf %219, %229 : vector<5x128xf32>
    %231 = arith.truncf %230 : vector<5x128xf32> to vector<5x128xbf16>
    %cst_95 = arith.constant dense<0.000000e+00> : vector<5x32xf32>
    %232 = tpu.matmul %231, %212, %cst_95 {dimension_numbers = #tpu.dot_dimension_numbers<[1], [0], [0], [1], [0, 0, 1, 1], [], []>} : vector<5x128xbf16>, vector<128x32xbf16>, vector<5x32xf32> -> vector<5x32xf32>
    %233 = vector.broadcast %213 : vector<1x32xf32> to vector<5x32xf32>
    %234 = arith.addf %232, %233 : vector<5x32xf32>
    %235 = arith.addf %185, %234 : vector<5x32xf32>
    %c0_96 = arith.constant 0 : index
    %c0_97 = arith.constant 0 : index
    %c0_98 = arith.constant 0 : index
    %236 = vector.load %arg21[%c0_96, %c0_97, %c0_98] : memref<1x5x32xf32, #tpu.memory_space<vmem>>, vector<1x5x32xf32>
    %237 = vector.shape_cast %236 : vector<1x5x32xf32> to vector<5x32xf32>
    %238 = vector.shape_cast %235 : vector<5x32xf32> to vector<1x5x32xf32>
    tpu.vector_store %arg21[%c0_96, %c0_97, %c0_98], %238 {strides = array<i32>} : memref<1x5x32xf32, #tpu.memory_space<vmem>>, vector<1x5x32xf32>,
    return
  }
  func.func @transform_0(%arg0: i32) -> (i32, i32, i32) {
    %c0_i32 = arith.constant 0 : i32
    %c0_i32_0 = arith.constant 0 : i32
    %c0_i32_1 = arith.constant 0 : i32
    return %arg0, %c0_i32, %c0_i32_0 : i32, i32, i32
  }
  func.func @transform_1(%arg0: i32) -> (i32, i32, i32) {
    %c0_i32 = arith.constant 0 : i32
    %c0_i32_0 = arith.constant 0 : i32
    %c0_i32_1 = arith.constant 0 : i32
    return %arg0, %c0_i32, %c0_i32_0 : i32, i32, i32
  }
  func.func @transform_2(%arg0: i32) -> (i32, i32) {
    %c0_i32 = arith.constant 0 : i32
    %c0_i32_0 = arith.constant 0 : i32
    %c0_i32_1 = arith.constant 0 : i32
    return %c0_i32, %c0_i32_0 : i32, i32
  }
  func.func @transform_3(%arg0: i32) -> (i32, i32) {
    %c0_i32 = arith.constant 0 : i32
    %c0_i32_0 = arith.constant 0 : i32
    %c0_i32_1 = arith.constant 0 : i32
    return %c0_i32, %c0_i32_0 : i32, i32
  }
  func.func @transform_4(%arg0: i32) -> (i32, i32) {
    %c0_i32 = arith.constant 0 : i32
    %c0_i32_0 = arith.constant 0 : i32
    %c0_i32_1 = arith.constant 0 : i32
    return %c0_i32, %c0_i32_0 : i32, i32
  }
  func.func @transform_5(%arg0: i32) -> (i32, i32) {
    %c0_i32 = arith.constant 0 : i32
    %c0_i32_0 = arith.constant 0 : i32
    %c0_i32_1 = arith.constant 0 : i32
    return %c0_i32, %c0_i32_0 : i32, i32
  }
  func.func @transform_6(%arg0: i32) -> (i32, i32) {
    %c0_i32 = arith.constant 0 : i32
    %c0_i32_0 = arith.constant 0 : i32
    %c0_i32_1 = arith.constant 0 : i32
    return %c0_i32, %c0_i32_0 : i32, i32
  }
  func.func @transform_7(%arg0: i32) -> (i32, i32) {
    %c0_i32 = arith.constant 0 : i32
    %c0_i32_0 = arith.constant 0 : i32
    %c0_i32_1 = arith.constant 0 : i32
    return %c0_i32, %c0_i32_0 : i32, i32
  }
  func.func @transform_8(%arg0: i32) -> (i32, i32) {
    %c0_i32 = arith.constant 0 : i32
    %c0_i32_0 = arith.constant 0 : i32
    %c0_i32_1 = arith.constant 0 : i32
    return %c0_i32, %c0_i32_0 : i32, i32
  }
  func.func @transform_9(%arg0: i32) -> (i32, i32) {
    %c0_i32 = arith.constant 0 : i32
    %c0_i32_0 = arith.constant 0 : i32
    %c0_i32_1 = arith.constant 0 : i32
    return %c0_i32, %c0_i32_0 : i32, i32
  }
  func.func @transform_10(%arg0: i32) -> (i32, i32) {
    %c0_i32 = arith.constant 0 : i32
    %c0_i32_0 = arith.constant 0 : i32
    %c0_i32_1 = arith.constant 0 : i32
    return %c0_i32, %c0_i32_0 : i32, i32
  }
  func.func @transform_11(%arg0: i32) -> (i32, i32) {
    %c0_i32 = arith.constant 0 : i32
    %c0_i32_0 = arith.constant 0 : i32
    %c0_i32_1 = arith.constant 0 : i32
    return %c0_i32, %c0_i32_0 : i32, i32
  }
  func.func @transform_12(%arg0: i32) -> (i32, i32) {
    %c0_i32 = arith.constant 0 : i32
    %c0_i32_0 = arith.constant 0 : i32
    %c0_i32_1 = arith.constant 0 : i32
    return %c0_i32, %c0_i32_0 : i32, i32
  }
  func.func @transform_13(%arg0: i32) -> (i32, i32) {
    %c0_i32 = arith.constant 0 : i32
    %c0_i32_0 = arith.constant 0 : i32
    %c0_i32_1 = arith.constant 0 : i32
    return %c0_i32, %c0_i32_0 : i32, i32
  }
  func.func @transform_14(%arg0: i32) -> (i32, i32) {
    %c0_i32 = arith.constant 0 : i32
    %c0_i32_0 = arith.constant 0 : i32
    %c0_i32_1 = arith.constant 0 : i32
    return %c0_i32, %c0_i32_0 : i32, i32
  }
  func.func @transform_15(%arg0: i32) -> (i32, i32) {
    %c0_i32 = arith.constant 0 : i32
    %c0_i32_0 = arith.constant 0 : i32
    %c0_i32_1 = arith.constant 0 : i32
    return %c0_i32, %c0_i32_0 : i32, i32
  }
  func.func @transform_16(%arg0: i32) -> (i32, i32) {
    %c0_i32 = arith.constant 0 : i32
    %c0_i32_0 = arith.constant 0 : i32
    %c0_i32_1 = arith.constant 0 : i32
    return %c0_i32, %c0_i32_0 : i32, i32
  }
  func.func @transform_17(%arg0: i32) -> (i32, i32) {
    %c0_i32 = arith.constant 0 : i32
    %c0_i32_0 = arith.constant 0 : i32
    %c0_i32_1 = arith.constant 0 : i32
    return %c0_i32, %c0_i32_0 : i32, i32
  }
  func.func @transform_18(%arg0: i32) -> (i32, i32) {
    %c0_i32 = arith.constant 0 : i32
    %c0_i32_0 = arith.constant 0 : i32
    %c0_i32_1 = arith.constant 0 : i32
    return %c0_i32, %c0_i32_0 : i32, i32
  }
  func.func @transform_19(%arg0: i32) -> (i32, i32) {
    %c0_i32 = arith.constant 0 : i32
    %c0_i32_0 = arith.constant 0 : i32
    %c0_i32_1 = arith.constant 0 : i32
    return %c0_i32, %c0_i32_0 : i32, i32
  }
  func.func @transform_20(%arg0: i32) -> (i32, i32, i32) {
    %c0_i32 = arith.constant 0 : i32
    %c0_i32_0 = arith.constant 0 : i32
    %c0_i32_1 = arith.constant 0 : i32
    return %arg0, %c0_i32, %c0_i32_0 : i32, i32, i32
  }
}

</mosaic_0001>

<bundles_post_ra>
// kernel: tnt_block_forward.2
= control target key start
LH: loop header
LB: loop body
LE: loop exit
PB: predicated region body
PF: predicated region fallthrough
CT: control target
= control target key end

     0   :  { %s1579_s29 = smov 0   ;;  %s1747_s0 = inlined_call_operand.vmem [shape: f32[32,16], index: 0, kind: input, shape index: {}]   ;;  %s1748_s1 = inlined_call_operand.vmem [shape: f32[1,16], index: 1, kind: input, shape index: {}]   ;;  %s1749_s2 = inlined_call_operand.vmem [shape: f32[1,16], index: 2, kind: input, shape index: {}]   ;;  %s1750_s3 = inlined_call_operand.vmem [shape: bf16[16,16], index: 3, kind: input, shape index: {}]   ;;  %s1751_s4 = inlined_call_operand.vmem [shape: bf16[16,16], index: 4, kind: input, shape index: {}]   ;;  %s1752_s5 = inlined_call_operand.vmem [shape: bf16[16,16], index: 5, kind: input, shape index: {}]   ;;  %s1753_s6 = inlined_call_operand.vmem [shape: bf16[16,16], index: 6, kind: input, shape index: {}]   ;;  %s1754_s7 = inlined_call_operand.vmem [shape: f32[1,16], index: 7, kind: input, shape index: {}]   ;;  %s1755_s8 = inlined_call_operand.vmem [shape: f32[1,16], index: 8, kind: input, shape index: {}]   ;;  %s1756_s9 = inlined_call_operand.vmem [shape: f32[1,16], index: 9, kind: input, shape index: {}]   ;;  %s1757_s10 = inlined_call_operand.vmem [shape: bf16[16,64], index: 10, kind: input, shape index: {}]   ;;  %s1758_s11 = inlined_call_operand.vmem [shape: f32[1,64], index: 11, kind: input, shape index: {}]   ;;  %s1759_s12 = inlined_call_operand.vmem [shape: bf16[64,16], index: 12, kind: input, shape index: {}]   ;;  %s1760_s13 = inlined_call_operand.vmem [shape: f32[1,16], index: 13, kind: input, shape index: {}]   ;;  %s1761_s14 = inlined_call_operand.vmem [shape: f32[32,16], index: 14, kind: output, shape index: {}]  }
   0x1 LB: > { %s1310_s30 = sadd.s32 4294967295, %s1498_s29   ;;  %p1314_p0 = scmp.ge.s32.totalorder %s1498_s29, 1  ;;  %s1498_s29 = sphi %s1579_s29, %s24_s29  }
   0x2   : > { %p413_p1 = scmp.lt.s32.totalorder %s1498_s29, 3 }
   0x4   : > { %p414_p2 = pnand %p1314_p0, %p413_p1 }
   0x5   : > { %s1315_s15 = sshll.u32 (!%p414_p2), %s1310_s30, 1  ;;  %s1502_s17 = smov (!%p414_p2), 120  }
   0x6   : > { %417 = sbr.rel (%p414_p2) target bundleno = 2317 (0x90d), region = 76  ;;  %p460_p3 = scmp.lt.s32.totalorder (!%p414_p2), %s1315_s15, 3 }
   0xb   : > { %s1763_s15 = smov (!%p460_p3, %s1315_s15), 3  ;;  %vm476_vm0 = vcmask 130048   ;;  %v1456_v14 = vld [vmem:[%s1750_s3] sm:$0xff]   ;;  %v1500_v16 = vmov 0.0   ;;  %vm1501_vm1 = vmmov 0   ;;  %vm689_vm2 = vcmask 64512  }
   0xc   : > { %s1316_s16 = sshll.u32 %s1763_s15, 3  ;;  %v1457_v15 = vld [vmem:[%s1752_s5] sm:$0xff]   ;;  %1372 = vmatprep.subr.bf16.mxu1 %v1500_v16  ;;  %1384 = vmatprep.subr.bf16.mxu0 %v1500_v16  ;;  %v677_v54 = vlaneseq  ;;  %v1503_v62 = vmov -1e+30   ;;  %vm941_vm5 = vcmask 1043456   ;;  %vm1205_vm6 = vcmask 523264  }
   0xd   : > { %s463_s19 = scalar_lea.vmem %s1747_s0, %s1316_s16  ;;  %1373 = vmatpush3.bf16.msra.mxu1 %v1456_v14  ;;  %1385 = vmatpush3.bf16.msra.mxu0 %v1457_v15  ;;  %v1319_v25 = vld [vmem:[%s1748_s1] ss:$0 sm:$0xff]  ;;  %s469_s18 = scalar_lea.vmem %s1761_s14, %s1316_s16 }
   0xe   : > { %v1595_v0 = vld [vmem:[%s463_s19] sm:$0xff]  ;;  %v1597_v1 = vld [vmem:[%s463_s19 + $0x8] sm:$0xff]  ;;  %1374 = vmatprep.mubr.msk.bf16.mxu1 %vm1501_vm1, %v1500_v16  ;;  %1386 = vmatprep.mubr.msk.bf16.mxu0 %vm1501_vm1, %v1500_v16  ;;  %v678_v55 = vshrl.u32 %v677_v54, 7  ;;  %v681_v56 = vand.u32 127, %v677_v54 }
   0xf   : > { %v477_v2 = vsel %vm476_vm0, %v1595_v0, 0.0  ;;  %v480_v3 = vsel %vm476_vm0, %v1597_v1, 0.0  ;;  %1378 = vmatprep.subr.bf16.mxu1 %v1500_v16  ;;  %1396 = vmatprep.subr.bf16.mxu0 %v1500_v16  ;;  %v1320_v29 = vld [vmem:[%s1749_s2] ss:$0 sm:$0xff] }
  0x10   : > { %478 = vadd.xlane.f32.xlu0 %v477_v2  ;;  %v1458_v33 = vld [vmem:[%s1751_s4] sm:$0xff]   ;;  %v682_v57 = vand.u32 4294967292, %v678_v55  ;;  %v684_v58 = vand.u32 4294967292, %v681_v56  ;;  %v679_v59 = vadd.s32 8, %v678_v55 }
  0x11   : > { %v526_v55 = vld [vmem:[%s1753_s6] sm:$0xf] }
  0x12   : > { %vm685_vm3 = vcmp.eq.s32.totalorder %v682_v57, %v684_v58  ;;  %v683_v60 = vand.u32 4294967292, %v679_v59  ;;  %v990_v59 = vsel %vm941_vm5, %v526_v55, 0  ;;  %v1461_v55 = vld [vmem:[%s1759_s12 + $0x10] sm:$0xff]  }
  0x13   : > { %v687_v63 = vsel %vm685_vm3, 0.0, %v1503_v62 }
  0x14   : > { %481 = vadd.xlane.f32.xlu0 %v480_v3  ;;  %vm686_vm4 = vcmp.eq.s32.totalorder %v683_v60, %v684_v58  ;;  %v527_v60 = vld [vmem:[%s1753_s6 + $0x4] sm:$0xf] }
  0x99   : > { %v479_v4 = vpop.xlane.xlu0 %478 }
  0x9a   : > { %v484_v5 = vmul.f32 0.0625, %v479_v4 }
  0x9c   : > { %v486_v6 = vsub.f32 %v1595_v0, %v484_v5 }
  0x9d   : > { %v482_v7 = vpop.xlane.xlu0 %481 }
  0x9e   : > { %v485_v8 = vmul.f32 0.0625, %v482_v7  ;;  %v488_v9 = vmul.f32 %v486_v6, %v486_v6 }
  0xa0   : > { %v487_v10 = vsub.f32 %v1597_v1, %v485_v8  ;;  %v490_v11 = vsel %vm476_vm0, %v488_v9, 0.0 }
  0xa1   : > { %491 = vadd.xlane.f32.xlu1 %v490_v11 }
  0xa2   : > { %v489_v12 = vmul.f32 %v487_v10, %v487_v10 }
  0xa4   : > { %v493_v13 = vsel %vm476_vm0, %v489_v12, 0.0 }
  0xa5   : > { %494 = vadd.xlane.f32.xlu1 %v493_v13 }
 0x12a   : > { %v492_v17 = vpop.xlane.xlu1 %491 }
 0x12b   : > { %v496_v18 = vmul.f32 0.0625, %v492_v17 }
 0x12d   : > { %v498_v19 = vadd.f32 1e-05, %v496_v18 }
 0x12e   : > { %v495_v20 = vpop.xlane.xlu1 %494 }
 0x12f   : > { %1464 = vrsqrt.f32 %v498_v19  ;;  %v497_v21 = vmul.f32 0.0625, %v495_v20 }
 0x131   : > { %v499_v22 = vadd.f32 1e-05, %v497_v21 }
 0x133   : > { %1466 = vrsqrt.f32 %v499_v22 }
 0x13c   : > { %v1465_v23 = vpop.eup %1464 }
 0x13d   : > { %v502_v24 = vmul.f32 %v1465_v23, %v486_v6  ;;  %v688_v6 = vsel %vm686_vm4, 0.0, %v1503_v62 }
 0x13f   : > { %v510_v28 = vmul.f32 %v1319_v25, %v502_v24 }
 0x140   : > { %v1467_v26 = vpop.eup %1466 }
 0x141   : > { %v503_v27 = vmul.f32 %v1467_v26, %v487_v10  ;;  %v518_v31 = vadd.f32 %v1320_v29, %v510_v28 }
 0x143   : > { %v511_v30 = vmul.f32 %v1319_v25, %v503_v27 }
 0x145   : > { %v519_v32 = vadd.f32 %v1320_v29, %v511_v30 }
 0x147   : > { %v529_v34 = vpack.c.bf16 %v519_v32, %v518_v31 }
 0x149   : > { %1375 = vmatmul.mubr.msk.bf16.vlgmr.msra.gmra.mxu1 %vm476_vm0, %v529_v34  ;;  %1387 = vmatmul.mubr.msk.bf16.vlgmr.msra.gmra.mxu0 %vm476_vm0, %v529_v34 }
 0x14a   : > { %1379 = vmatpush3.bf16.msra.mxu1 %v1458_v33  ;;  %1380 = vmatprep.mubr.msk.bf16.mxu1 %vm1501_vm1, %v1500_v16 }
 0x14b   : > { %1390 = vmatprep.subr.bf16.mxu1 %v1500_v16  ;;  %1398 = vmatprep.mubr.msk.bf16.mxu0 %vm1501_vm1, %v1500_v16 }
 0x151   : > { %1381 = vmatmul.mubr.msk.bf16.vlgmr.msra.gmra.mxu1 %vm476_vm0, %v529_v34 }
 0x152   : > { %1392 = vmatprep.mubr.msk.bf16.mxu1 %vm1501_vm1, %v1500_v16 }
 0x209   : > { %v573_v35 = vpop.f32.mrf.mxu1  ;;  %v669_v36 = vpop.f32.mrf.mxu0 }
 0x20b   : > { %v1376_v37 = vpop.f32.mrf.mxu1  ;;  %v1388_v38 = vpop.f32.mrf.mxu0 }
 0x20d   : > { %v576_v39 = vpop.f32.mrf.mxu1  ;;  %v672_v40 = vpop.f32.mrf.mxu0 }
 0x20e   : > { %v580_v41 = vpack.c.bf16 %v576_v39, %v573_v35  ;;  %v1640_v42 = vpack.c.bf16 %v672_v40, %v669_v36 }
 0x20f   : > { %v1377_v43 = vpop.f32.mrf.mxu1  ;;  %v1389_v44 = vpop.f32.mrf.mxu0 }
 0x210   : > { %1397 = vmatpush3.bf16.msra.mxu0 %v1640_v42  ;;  %810 = vrot.lane.b32.xlu1 %v580_v41, %s1502_s17 }
 0x211   : > { %v621_v45 = vpop.f32.mrf.mxu1  ;;  %1408 = vmatprep.subr.bf16.mxu0 %v1500_v16 }
 0x213   : > { %v1382_v46 = vpop.f32.mrf.mxu1 }
 0x215   : > { %v624_v47 = vpop.f32.mrf.mxu1 }
 0x216   : > { %v628_v48 = vpack.c.bf16 %v624_v47, %v621_v45 }
 0x217   : > { %v1383_v49 = vpop.f32.mrf.mxu1 }
 0x218   : > { %v694_v50 = vsel %vm689_vm2, %v628_v48, 0  ;;  %813 = vrot.lane.b32.xlu0 %v628_v48, %s1502_s17 }
 0x219   : > { %1391 = vmatpush3.bf16.xpose.msra.mxu1 %v694_v50 }
 0x21a   : > { %1402 = vmatprep.subr.bf16.mxu1 %v1500_v16 }
 0x220   : > { %1393 = vmatmul.mubr.msk.bf16.vlgmr.msra.gmra.mxu1 %vm689_vm2, %v580_v41 }
 0x221   : > { %1404 = vmatprep.mubr.msk.bf16.mxu1 %vm1501_vm1, %v1500_v16 }
 0x282   : > { %v811_v53 = vpop.permute.xlu1 %810 }
 0x28a   : > { %v814_v51 = vpop.permute.xlu0 %813 }
 0x28b   : > { %v819_v52 = vsel %vm689_vm2, %v814_v51, 0 }
 0x28c   : > { %1403 = vmatpush3.bf16.xpose.msra.mxu1 %v819_v52 }
 0x28d   : > { %1414 = vmatprep.subr.bf16.mxu1 %v1500_v16 }
 0x293   : > { %1405 = vmatmul.mubr.msk.bf16.vlgmr.msra.gmra.mxu1 %vm689_vm2, %v811_v53 }
 0x294   : > { %1416 = vmatprep.mubr.msk.bf16.mxu1 %vm1501_vm1, %v1500_v16 }
 0x2e0   : > { %v730_v61 = vpop.f32.mrf.mxu1 }
 0x2e1   : > { %v737_v2 = vmul.f32 0.35355338, %v730_v61  ;;  %v943_v61 = vsel %vm941_vm5, %v527_v60, 0 }
 0x2e2   : > { %v1394_v3 = vpop.f32.mrf.mxu1  ;;  %1415 = vmatpush3.bf16.msra.mxu1 %v943_v61 }
 0x2e3   : > { %v739_v4 = vadd.f32 %v737_v2, %v687_v63  ;;  %1426 = vmatprep.subr.bf16.mxu1 %v1500_v16 }
 0x2e4   : > { %v733_v5 = vpop.f32.mrf.mxu1 }
 0x2e5   : > { %v738_v7 = vmul.f32 0.35355338, %v733_v5  ;;  %v741_v8 = vsel %vm476_vm0, %v739_v4, -inf }
 0x2e6   : > { %742 = vmax.xlane.f32.xlu1 %v741_v8  ;;  %v1395_v9 = vpop.f32.mrf.mxu1 }
 0x2e7   : > { %v740_v10 = vadd.f32 %v738_v7, %v688_v6 }
 0x2e9   : > { %v744_v11 = vsel %vm476_vm0, %v740_v10, -inf }
 0x2ea   : > { %745 = vmax.xlane.f32.xlu0 %v744_v11 }
 0x353   : > { %v855_v12 = vpop.f32.mrf.mxu1 }
 0x354   : > { %v862_v13 = vmul.f32 0.35355338, %v855_v12 }
 0x355   : > { %v1406_v14 = vpop.f32.mrf.mxu1 }
 0x356   : > { %v864_v15 = vadd.f32 %v862_v13, %v687_v63  ;;  %v1333_v14 = vld [vmem:[%s1754_s7] ss:$0 sm:$0xff] }
 0x357   : > { %v858_v17 = vpop.f32.mrf.mxu1 }
 0x358   : > { %v863_v18 = vmul.f32 0.35355338, %v858_v17  ;;  %v866_v19 = vsel %vm476_vm0, %v864_v15, -inf }
 0x359   : > { %867 = vmax.xlane.f32.xlu0 %v866_v19  ;;  %v1407_v20 = vpop.f32.mrf.mxu1 }
 0x35a   : > { %v865_v21 = vadd.f32 %v863_v18, %v688_v6 }
 0x35c   : > { %v869_v22 = vsel %vm476_vm0, %v865_v21, -inf }
 0x35d   : > { %870 = vmax.xlane.f32.xlu1 %v869_v22 }
 0x36f   : > { %v743_v23 = vpop.xlane.xlu1 %742 }
 0x370   : > { %v747_v24 = vsub.f32 %v739_v4, %v743_v23 }
 0x372   : > { %v749_v25 = vmul.f32 1.442695, %v747_v24 }
 0x373   : > { %v746_v26 = vpop.xlane.xlu0 %745 }
 0x374   : > { %1468 = vpow2.f32 %v749_v25  ;;  %v748_v27 = vsub.f32 %v740_v10, %v746_v26 }
 0x376   : > { %v751_v28 = vmul.f32 1.442695, %v748_v27 }
 0x378   : > { %1470 = vpow2.f32 %v751_v28 }
 0x381   : > { %v1469_v29 = vpop.eup %1468 }
 0x382   : > { %v753_v30 = vsel %vm476_vm0, %v1469_v29, 0.0 }
 0x383   : > { %754 = vadd.xlane.f32.xlu0 %v753_v30 }
 0x385   : > { %v1471_v31 = vpop.eup %1470 }
 0x386   : > { %v756_v32 = vsel %vm476_vm0, %v1471_v31, 0.0 }
 0x387   : > { %757 = vadd.xlane.f32.xlu1 %v756_v32 }
 0x3e2   : > { %v868_v33 = vpop.xlane.xlu0 %867 }
 0x3e3   : > { %v872_v34 = vsub.f32 %v864_v15, %v868_v33 }
 0x3e5   : > { %v874_v35 = vmul.f32 1.442695, %v872_v34 }
 0x3e6   : > { %v871_v36 = vpop.xlane.xlu1 %870 }
 0x3e7   : > { %1472 = vpow2.f32 %v874_v35  ;;  %v873_v37 = vsub.f32 %v865_v21, %v871_v36  ;;  %v1459_v36 = vld [vmem:[%s1757_s10] sm:$0xff]  }
 0x3e9   : > { %v876_v38 = vmul.f32 1.442695, %v873_v37 }
 0x3eb   : > { %1474 = vpow2.f32 %v876_v38 }
 0x3f4   : > { %v1473_v39 = vpop.eup %1472 }
 0x3f5   : > { %v878_v40 = vsel %vm476_vm0, %v1473_v39, 0.0 }
 0x3f6   : > { %879 = vadd.xlane.f32.xlu0 %v878_v40 }
 0x3f8   : > { %v1475_v41 = vpop.eup %1474 }
 0x3f9   : > { %v881_v43 = vsel %vm476_vm0, %v1475_v41, 0.0 }
 0x3fa   : > { %882 = vadd.xlane.f32.xlu1 %v881_v43 }
 0x40c   : > { %890 = vrot.lane.b32.xlu0 %v1640_v42, %s1502_s17  ;;  %v755_v44 = vpop.xlane.xlu0 %754 }
 0x40d   : > { %1476 = vrcp.f32 %v755_v44 }
 0x410   : > { %v758_v45 = vpop.xlane.xlu1 %757 }
 0x411   : > { %1478 = vrcp.f32 %v758_v45 }
 0x41a   : > { %v1477_v46 = vpop.eup %1476 }
 0x41b   : > { %v761_v48 = vmul.f32 %v1477_v46, %v1469_v29  ;;  %v1334_v46 = vld [vmem:[%s1755_s8] ss:$0 sm:$0xff] }
 0x41e   : > { %v1479_v47 = vpop.eup %1478 }
 0x41f   : > { %v762_v49 = vmul.f32 %v1479_v47, %v1471_v31 }
 0x421   : > { %v763_v50 = vpack.c.bf16 %v762_v49, %v761_v48 }
 0x423   : > { %1399 = vmatmul.mubr.msk.bf16.vlgmr.msra.gmra.mxu0 %vm476_vm0, %v763_v50  ;;  %v1335_v50 = vld [vmem:[%s1756_s9] ss:$0 sm:$0xff] }
 0x424   : > { %1410 = vmatprep.mubr.msk.bf16.mxu0 %vm1501_vm1, %v1500_v16 }
 0x47f   : > { %v880_v51 = vpop.xlane.xlu0 %879 }
 0x480   : > { %1480 = vrcp.f32 %v880_v51 }
 0x483   : > { %v891_v52 = vpop.permute.xlu0 %890  ;;  %v883_v53 = vpop.xlane.xlu1 %882 }
 0x484   : > { %1482 = vrcp.f32 %v883_v53  ;;  %1409 = vmatpush3.bf16.msra.mxu0 %v891_v52 }
 0x485   : > { %1420 = vmatprep.subr.bf16.mxu0 %v1500_v16 }
 0x48d   : > { %v1481_v42 = vpop.eup %1480 }
 0x48e   : > { %v886_v56 = vmul.f32 %v1481_v42, %v1473_v39 }
 0x491   : > { %v1483_v54 = vpop.eup %1482 }
 0x492   : > { %v887_v57 = vmul.f32 %v1483_v54, %v1475_v41  ;;  %v1460_v54 = vld [vmem:[%s1759_s12 + $0x18] sm:$0xff]  }
 0x494   : > { %v888_v58 = vpack.c.bf16 %v887_v57, %v886_v56  ;;  %v1462_v56 = vld [vmem:[%s1759_s12 + $0x8] sm:$0xff]   ;;  %v1463_v57 = vld [vmem:[%s1759_s12] sm:$0xff]  }
 0x496   : > { %1411 = vmatmul.mubr.msk.bf16.vlgmr.msra.gmra.mxu0 %vm476_vm0, %v888_v58  ;;  %v1336_v58 = vld [vmem:[%s1758_s11] ss:$0 sm:$0xff] }
 0x497   : > { %1421 = vmatpush3.bf16.msra.mxu0 %v990_v59  ;;  %1422 = vmatprep.mubr.msk.bf16.mxu0 %vm1501_vm1, %v1500_v16 }
 0x498   : > { %1432 = vmatprep.subr.bf16.mxu0 %v1500_v16 }
 0x4e3   : > { %v801_v62 = vpop.f32.mrf.mxu0 }
 0x4e5   : > { %v1400_v63 = vpop.f32.mrf.mxu0 }
 0x4e7   : > { %v804_v2 = vpop.f32.mrf.mxu0 }
 0x4e8   : > { %v808_v3 = vpack.c.bf16 %v804_v2, %v801_v62 }
 0x4e9   : > { %v1401_v4 = vpop.f32.mrf.mxu0 }
 0x4ea   : > { %1423 = vmatmul.mubr.msk.bf16.vlgmr.msra.gmra.mxu0 %vm689_vm2, %v808_v3 }
 0x4eb   : > { %1440 = vmatprep.mubr.msk.bf16.mxu0 %vm1501_vm1, %v1500_v16  ;;  %1433 = vmatpush3.bf16.msra.mxu0 %v1460_v54 }
 0x4ec   : > { %1434 = vmatprep.subr.bf16.mxu0 %v1500_v16 }
 0x4ef   : > { %1435 = vmatpush3.bf16.msra.mxu0 %v1461_v55 }
 0x4f0   : > { %1436 = vmatprep.subr.bf16.mxu0 %v1500_v16 }
 0x4f3   : > { %1437 = vmatpush3.bf16.msra.mxu0 %v1462_v56 }
 0x4f4   : > { %1438 = vmatprep.subr.bf16.mxu0 %v1500_v16 }
 0x4f7   : > { %1439 = vmatpush3.bf16.msra.mxu0 %v1463_v57 }
 0x556   : > { %v930_v5 = vpop.f32.mrf.mxu0 }
 0x558   : > { %v1412_v6 = vpop.f32.mrf.mxu0 }
 0x55a   : > { %v933_v7 = vpop.f32.mrf.mxu0 }
 0x55b   : > { %v937_v8 = vpack.c.bf16 %v933_v7, %v930_v5 }
 0x55c   : > { %v1413_v9 = vpop.f32.mrf.mxu0 }
 0x55d   : > { %1417 = vmatmul.mubr.msk.bf16.vlgmr.msra.gmra.mxu1 %vm689_vm2, %v937_v8 }
 0x55e   : > { %1428 = vmatprep.mubr.msk.bf16.mxu1 %vm1501_vm1, %v1500_v16  ;;  %1427 = vmatpush3.bf16.msra.mxu1 %v1459_v36 }
 0x5aa   : > { %v1026_v10 = vpop.f32.mrf.mxu0 }
 0x5ac   : > { %v1424_v11 = vpop.f32.mrf.mxu0 }
 0x5ae   : > { %v1029_v12 = vpop.f32.mrf.mxu0 }
 0x5b0   : > { %v1425_v13 = vpop.f32.mrf.mxu0 }
 0x61d   : > { %v979_v15 = vpop.f32.mrf.mxu1 }
 0x61e   : > { %v1027_v17 = vadd.f32 %v1026_v10, %v979_v15 }
 0x61f   : > { %v1418_v18 = vpop.f32.mrf.mxu1 }
 0x620   : > { %v1039_v19 = vadd.f32 %v1333_v14, %v1027_v17 }
 0x621   : > { %v982_v20 = vpop.f32.mrf.mxu1 }
 0x622   : > { %v1691_v21 = vadd.f32 %v1039_v19, %v1595_v0  ;;  %v1030_v22 = vadd.f32 %v1029_v12, %v982_v20 }
 0x623   : > { %v1419_v23 = vpop.f32.mrf.mxu1 }
 0x624   : > { %v1040_v24 = vadd.f32 %v1333_v14, %v1030_v22  ;;  %v1045_v25 = vsel %vm476_vm0, %v1691_v21, 0.0  ;;  %v1339_v23 = vld [vmem:[%s1760_s13] ss:$0 sm:$0xff] }
 0x625   : > { %1046 = vadd.xlane.f32.xlu1 %v1045_v25 }
 0x626   : > { %v1696_v26 = vadd.f32 %v1040_v24, %v1597_v1 }
 0x628   : > { %v1048_v27 = vsel %vm476_vm0, %v1696_v26, 0.0 }
 0x629   : > { %1049 = vadd.xlane.f32.xlu1 %v1048_v27 }
 0x6ae   : > { %v1047_v28 = vpop.xlane.xlu1 %1046 }
 0x6af   : > { %v1051_v29 = vmul.f32 0.0625, %v1047_v28 }
 0x6b1   : > { %v1053_v30 = vsub.f32 %v1691_v21, %v1051_v29 }
 0x6b2   : > { %v1050_v0 = vpop.xlane.xlu1 %1049 }
 0x6b3   : > { %v1052_v31 = vmul.f32 0.0625, %v1050_v0  ;;  %v1055_v32 = vmul.f32 %v1053_v30, %v1053_v30 }
 0x6b5   : > { %v1054_v33 = vsub.f32 %v1696_v26, %v1052_v31  ;;  %v1057_v34 = vsel %vm476_vm0, %v1055_v32, 0.0 }
 0x6b6   : > { %1058 = vadd.xlane.f32.xlu1 %v1057_v34 }
 0x6b7   : > { %v1056_v35 = vmul.f32 %v1054_v33, %v1054_v33 }
 0x6b9   : > { %v1060_v1 = vsel %vm476_vm0, %v1056_v35, 0.0 }
 0x6ba   : > { %1061 = vadd.xlane.f32.xlu1 %v1060_v1 }
 0x73f   : > { %v1059_v37 = vpop.xlane.xlu1 %1058 }
 0x740   : > { %v1063_v38 = vmul.f32 0.0625, %v1059_v37 }
 0x742   : > { %v1065_v39 = vadd.f32 1e-05, %v1063_v38 }
 0x743   : > { %v1062_v40 = vpop.xlane.xlu1 %1061 }
 0x744   : > { %1484 = vrsqrt.f32 %v1065_v39  ;;  %v1064_v41 = vmul.f32 0.0625, %v1062_v40 }
 0x746   : > { %v1066_v43 = vadd.f32 1e-05, %v1064_v41 }
 0x748   : > { %1486 = vrsqrt.f32 %v1066_v43 }
 0x751   : > { %v1485_v44 = vpop.eup %1484 }
 0x752   : > { %v1069_v45 = vmul.f32 %v1485_v44, %v1053_v30 }
 0x754   : > { %v1077_v49 = vmul.f32 %v1334_v46, %v1069_v45 }
 0x755   : > { %v1487_v47 = vpop.eup %1486 }
 0x756   : > { %v1070_v48 = vmul.f32 %v1487_v47, %v1054_v33  ;;  %v1085_v52 = vadd.f32 %v1335_v50, %v1077_v49 }
 0x758   : > { %v1078_v51 = vmul.f32 %v1334_v46, %v1070_v48 }
 0x75a   : > { %v1086_v53 = vadd.f32 %v1335_v50, %v1078_v51 }
 0x75c   : > { %v1099_v42 = vpack.c.bf16 %v1086_v53, %v1085_v52 }
 0x75e   : > { %1429 = vmatmul.mubr.msk.bf16.vlgmr.msra.gmra.mxu1 %vm476_vm0, %v1099_v42 }
 0x81e   : > { %v1149_v59 = vpop.f32.mrf.mxu1 }
 0x81f   : > { %v1150_v60 = vadd.f32 %v1336_v58, %v1149_v59 }
 0x820   : > { %v1430_v61 = vpop.f32.mrf.mxu1 }
 0x821   : > { %v1158_v62 = vmul.f32 0.044715, %v1150_v60  ;;  %v1156_v15 = vmul.f32 0.5, %v1150_v60 }
 0x822   : > { %v1152_v63 = vpop.f32.mrf.mxu1 }
 0x823   : > { %v1160_v2 = vmul.f32 %v1158_v62, %v1150_v60  ;;  %v1153_v3 = vadd.f32 %v1336_v58, %v1152_v63 }
 0x824   : > { %v1431_v4 = vpop.f32.mrf.mxu1 }
 0x825   : > { %v1162_v5 = vmul.f32 %v1160_v2, %v1150_v60  ;;  %v1159_v6 = vmul.f32 0.044715, %v1153_v3  ;;  %v1157_v17 = vmul.f32 0.5, %v1153_v3 }
 0x827   : > { %v1164_v7 = vadd.f32 %v1162_v5, %v1150_v60  ;;  %v1161_v8 = vmul.f32 %v1159_v6, %v1153_v3 }
 0x829   : > { %v1166_v9 = vmul.f32 0.7978846, %v1164_v7  ;;  %v1163_v10 = vmul.f32 %v1161_v8, %v1153_v3 }
 0x82b   : > { %1488 = vtanh.f32 %v1166_v9  ;;  %v1165_v16 = vadd.f32 %v1163_v10, %v1153_v3 }
 0x82d   : > { %v1167_v11 = vmul.f32 0.7978846, %v1165_v16 }
 0x82f   : > { %1490 = vtanh.f32 %v1167_v11 }
 0x838   : > { %v1489_v12 = vpop.eup %1488 }
 0x839   : > { %v1170_v13 = vadd.f32 1.0, %v1489_v12 }
 0x83b   : > { %v1172_v19 = vmul.f32 %v1170_v13, %v1156_v15 }
 0x83c   : > { %v1491_v14 = vpop.eup %1490 }
 0x83d   : > { %v1171_v18 = vadd.f32 1.0, %v1491_v14 }
 0x83f   : > { %v1173_v20 = vmul.f32 %v1171_v18, %v1157_v17 }
 0x841   : > { %v1174_v22 = vpack.c.bf16 %v1173_v20, %v1172_v19 }
 0x843   : > { %1441 = vmatmul.mubr.msk.bf16.vlgmr.msra.gmra.mxu0 %vm1205_vm6, %v1174_v22 }
 0x903   : > { %v1243_v24 = vpop.f32.mrf.mxu0 }
 0x904   : > { %v1244_v25 = vadd.f32 %v1339_v23, %v1243_v24 }
 0x905   : > { %v1442_v27 = vpop.f32.mrf.mxu0 }
 0x906   : > { %v1250_v28 = vadd.f32 %v1244_v25, %v1691_v21 }
 0x907   : > { %v1246_v29 = vpop.f32.mrf.mxu0 }
 0x908   : > { %1252 = vst.msk [vmem:[%s469_s18] sm:$0xff] %vm476_vm0, %v1250_v28  ;;  %v1247_v30 = vadd.f32 %v1339_v23, %v1246_v29 }
 0x909   : > { %v1443_v0 = vpop.f32.mrf.mxu0 }
 0x90a   : > { %v1251_v31 = vadd.f32 %v1247_v30, %v1696_v26 }
 0x90c   : > { %1253 = vst.msk [vmem:[%s469_s18 + $0x8] sm:$0xff] %vm476_vm0, %v1251_v31 }
 0x90d PF: > { %s24_s29 = sadd.s32 1, %s1498_s29  }
 0x90e   : > { %p21_p4 = scmp.ge.s32.totalorder %s24_s29, 4  }
 0x910   :  { %23 = sbr.rel (!%p21_p4) target bundleno = 1 (0x1), region = 106 }

// kernel: tnt_block_forward.3
= control target key start
LH: loop header
LB: loop body
LE: loop exit
PB: predicated region body
PF: predicated region fallthrough
CT: control target
= control target key end

     0   :  { %s2642_s0 = inlined_call_operand.vmem [shape: f32[2,4,64], index: 0, kind: input, shape index: {}]   ;;  %s2643_s1 = inlined_call_operand.vmem [shape: f32[2,5,32], index: 1, kind: input, shape index: {}]   ;;  %s2644_s2 = inlined_call_operand.vmem [shape: f32[1,64], index: 2, kind: input, shape index: {}]   ;;  %s2645_s3 = inlined_call_operand.vmem [shape: f32[1,64], index: 3, kind: input, shape index: {}]   ;;  %s2646_s4 = inlined_call_operand.vmem [shape: bf16[64,32], index: 4, kind: input, shape index: {}]   ;;  %s2647_s5 = inlined_call_operand.vmem [shape: f32[1,32], index: 5, kind: input, shape index: {}]   ;;  %s2648_s6 = inlined_call_operand.vmem [shape: f32[1,32], index: 6, kind: input, shape index: {}]   ;;  %s2649_s7 = inlined_call_operand.vmem [shape: f32[1,32], index: 7, kind: input, shape index: {}]   ;;  %s2650_s8 = inlined_call_operand.vmem [shape: f32[1,32], index: 8, kind: input, shape index: {}]   ;;  %s2651_s9 = inlined_call_operand.vmem [shape: bf16[32,32], index: 9, kind: input, shape index: {}]   ;;  %s2652_s10 = inlined_call_operand.vmem [shape: bf16[32,32], index: 10, kind: input, shape index: {}]   ;;  %s2653_s11 = inlined_call_operand.vmem [shape: bf16[32,32], index: 11, kind: input, shape index: {}]   ;;  %s2654_s12 = inlined_call_operand.vmem [shape: bf16[32,32], index: 12, kind: input, shape index: {}]   ;;  %s2655_s13 = inlined_call_operand.vmem [shape: f32[1,32], index: 13, kind: input, shape index: {}]   ;;  %s2656_s14 = inlined_call_operand.vmem [shape: f32[1,32], index: 14, kind: input, shape index: {}]   ;;  %s2657_s15 = inlined_call_operand.vmem [shape: f32[1,32], index: 15, kind: input, shape index: {}]   ;;  %s2658_s16 = inlined_call_operand.vmem [shape: bf16[32,128], index: 16, kind: input, shape index: {}]   ;;  %s2659_s17 = inlined_call_operand.vmem [shape: f32[1,128], index: 17, kind: input, shape index: {}]   ;;  %s2660_s18 = inlined_call_operand.vmem [shape: bf16[128,32], index: 18, kind: input, shape index: {}]   ;;  %s2661_s19 = inlined_call_operand.vmem [shape: f32[1,32], index: 19, kind: input, shape index: {}]   ;;  %s2662_s20 = inlined_call_operand.vmem [shape: f32[2,5,32], index: 20, kind: output, shape index: {}]  }
   0x1   :  { %2664 = sst [smem:[#allocation2_spill]] %s2642_s0 }
   0x2   :  { %2665 = sst [smem:[#allocation3_spill]] %s2643_s1  ;;  %s2355_s1 = smov 0  }
   0x3   :  { %2666 = sst [smem:[#allocation4_spill]] %s2644_s2 }
   0x4   :  { %2667 = sst [smem:[#allocation5_spill]] %s2645_s3 }
   0x5   :  { %2668 = sst [smem:[#allocation6_spill]] %s2646_s4 }
   0x6 LB: > { %s1932_s22 = sadd.s32 4294967295, %s2242_s1   ;;  %p1936_p0 = scmp.ge.s32.totalorder %s2242_s1, 1  ;;  %s2242_s1 = sphi %s2355_s1, %s30_s1  }
   0x7   : > { %p570_p1 = scmp.lt.s32.totalorder %s2242_s1, 3 }
   0x9   : > { %p571_p2 = pnand %p1936_p0, %p570_p1 }
   0xa   : > { %p630_p3 = scmp.lt.s32.totalorder (!%p571_p2), %s1932_s22, 1  ;;  %s2669_s25 = sld [smem:[#allocation2_spill]] (!%p571_p2) }
   0xb   : > { %574 = sbr.rel (%p571_p2) target bundleno = 4338 (0x10f2), region = 100  ;;  %s2670_s28 = sld [smem:[#allocation6_spill]] (!%p571_p2) }
   0xc   : > { %s2672_s27 = sld [smem:[#allocation5_spill]] (!%p571_p2)  ;;  %s2247_s0 = smov (!%p571_p2), 120  }
   0xd   : > { %s2673_s2 = sld [smem:[#allocation3_spill]] (!%p571_p2)  ;;  %s2248_s21 = smov (!%p571_p2), 112  }
  0x10   : > { %s2675_s22 = smov (!%p630_p3, %s1932_s22), 1  ;;  %vm647_vm0 = vcmask 519168   ;;  %v2244_v8 = vmov 0.0   ;;  %vm2245_vm1 = vmmov 0   ;;  %vm709_vm2 = vcmask 523264   ;;  %v2194_v51 = vld [vmem:[%s2651_s9 + $0x8] sm:$0xff]  }
  0x11   : > { %s1937_s23 = sshll.u32 %s2675_s22, 2  ;;  %v2190_v7 = vld [vmem:[%s2670_s28 + $0x18] sm:$0xff]   ;;  %2040 = vmatprep.subr.bf16.mxu1 %v2244_v8  ;;  %2048 = vmatprep.mubr.msk.bf16.mxu1 %vm2245_vm1, %v2244_v8  ;;  %v2191_v9 = vld [vmem:[%s2670_s28 + $0x10] sm:$0xff]   ;;  %v2192_v10 = vld [vmem:[%s2670_s28 + $0x8] sm:$0xff]   ;;  %vm755_vm3 = vcmask 257024   ;;  %s1938_s30 = sshll.u32 %s2675_s22, 3 }
  0x12   : > { %s633_s3 = scalar_lea.vmem %s2669_s25, %s1937_s23  ;;  %2041 = vmatpush3.bf16.msra.mxu1 %v2190_v7  ;;  %2068 = vmatprep.subr.bf16.mxu0 %v2244_v8  ;;  %v2193_v11 = vld [vmem:[%s2670_s28] sm:$0xff]   ;;  %s2671_s25 = sld [smem:[#allocation4_spill]]  ;;  %vm787_vm4 = vcmask 1040384   ;;  %vm792_vm5 = vcmask 258048   ;;  %v2195_v52 = vld [vmem:[%s2653_s11 + $0x8] sm:$0xff]   ;;  %vm850_vm6 = vcmask 261120  }
  0x13   : > { %v643_v0 = vld [vmem:[%s633_s3] sm:$0xf]  ;;  %2042 = vmatprep.subr.bf16.mxu1 %v2244_v8  ;;  %2072 = vmatprep.mubr.msk.bf16.mxu0 %vm2245_vm1, %v2244_v8  ;;  %vm1066_vm7 = vcmask 1041408   ;;  %vm1067_vm8 = vcmask 1042432   ;;  %vm1001_vm9 = vcmask 64512   ;;  %vm1049_vm10 = vcmask 36864   ;;  %s641_s29 = scalar_lea.vmem %s2662_s20, %s1938_s30 }
  0x14   : > { %v648_v1 = vsel %vm647_vm0, %v643_v0, 0.0  ;;  %v1941_v18 = vld [vmem:[%s2672_s27] ss:$0 sm:$0xff]  ;;  %2069 = vmatpush3.bf16.msra.mxu0 %v2195_v52  ;;  %vm1062_vm11 = vcmask 39936   ;;  %vm1232_vm12 = vcmask 1043456   ;;  %s2249_s3 = smov 104  }
  0x15   : > { %649 = vadd.xlane.f32.xlu0 %v648_v1  ;;  %v1947_v36 = vld [vmem:[%s2647_s5] ss:$0 sm:$0xff]  ;;  %2070 = vmatprep.subr.bf16.mxu0 %v2244_v8 }
  0x16   : > { %2043 = vmatpush3.bf16.msra.mxu1 %v2191_v9  ;;  %v1948_v38 = vld [vmem:[%s2648_s6] ss:$0 sm:$0xff] }
  0x17   : > { %2044 = vmatprep.subr.bf16.mxu1 %v2244_v8  ;;  %v2196_v53 = vld [vmem:[%s2651_s9] sm:$0xff]  }
  0x18   : > { %v1940_v16 = vld [vmem:[%s2671_s25] ss:$0 sm:$0xff]  ;;  %s637_s25 = scalar_lea.vmem %s2673_s2, %s1938_s30 }
  0x19   : > { %v644_v41 = vld [vmem:[%s637_s25] sm:$0x1f] }
  0x1a   : > { %2045 = vmatpush3.bf16.msra.mxu1 %v2192_v10  ;;  %v2197_v54 = vld [vmem:[%s2653_s11] sm:$0xff]  }
  0x1b   : > { %2046 = vmatprep.subr.bf16.mxu1 %v2244_v8  ;;  %2071 = vmatpush3.bf16.msra.mxu0 %v2197_v54  ;;  %v1949_v59 = vld [vmem:[%s2649_s7] ss:$0 sm:$0xff] }
  0x1c   : > { %2082 = vmatprep.subr.bf16.mxu0 %v2244_v8  ;;  %v1950_v61 = vld [vmem:[%s2650_s8] ss:$0 sm:$0xff] }
  0x1e   : > { %2047 = vmatpush3.bf16.msra.mxu1 %v2193_v11 }
  0x1f   : > { %2052 = vmatprep.subr.bf16.mxu1 %v2244_v8 }
  0x9e   : > { %v650_v2 = vpop.xlane.xlu0 %649 }
  0x9f   : > { %v652_v3 = vmul.f32 0.015625, %v650_v2  ;;  %v2199_v2 = vld [vmem:[%s2652_s10] sm:$0xff]  }
  0xa1   : > { %v653_v4 = vsub.f32 %v643_v0, %v652_v3  ;;  %v2198_v0 = vld [vmem:[%s2652_s10 + $0x8] sm:$0xff]   ;;  %v2246_v3 = vmov 65535  }
  0xa3   : > { %v654_v5 = vmul.f32 %v653_v4, %v653_v4 }
  0xa5   : > { %v655_v6 = vsel %vm647_vm0, %v654_v5, 0.0 }
  0xa6   : > { %656 = vadd.xlane.f32.xlu0 %v655_v6 }
 0x12f   : > { %v657_v12 = vpop.xlane.xlu0 %656 }
 0x130   : > { %v658_v13 = vmul.f32 0.015625, %v657_v12 }
 0x132   : > { %v659_v14 = vadd.f32 1e-05, %v658_v13 }
 0x134   : > { %2210 = vrsqrt.f32 %v659_v14 }
 0x141   : > { %v2211_v15 = vpop.eup %2210 }
 0x142   : > { %v661_v17 = vmul.f32 %v2211_v15, %v653_v4  ;;  %v1068_v4 = vsel %vm1066_vm7, 4294967295, %v2246_v3 }
 0x143   : > { %v2456_v7 = vsel %vm1067_vm8, %v1068_v4, 0 }
 0x144   : > { %v668_v19 = vmul.f32 %v1940_v16, %v661_v17 }
 0x146   : > { %v675_v20 = vadd.f32 %v1941_v18, %v668_v19 }
 0x148   : > { %v676_v21 = vpack.c.bf16 %v675_v20, %v675_v20 }
 0x14a   : > { %2049 = vmatmul.mubr.msk.bf16.vlgmr.msra.gmra.mxu1 %vm709_vm2, %v676_v21 }
 0x14b   : > { %2056 = vmatprep.mubr.msk.bf16.mxu1 %vm2245_vm1, %v2244_v8  ;;  %2053 = vmatpush3.bf16.msra.mxu1 %v2194_v51 }
 0x14c   : > { %2054 = vmatprep.subr.bf16.mxu1 %v2244_v8 }
 0x14f   : > { %2055 = vmatpush3.bf16.msra.mxu1 %v2196_v53 }
 0x150   : > { %2060 = vmatprep.subr.bf16.mxu1 %v2244_v8 }
 0x20a   : > { %v747_v22 = vpop.f32.mrf.mxu1 }
 0x20b   : > { %v756_v23 = vsel %vm755_vm3, %v747_v22, 0.0 }
 0x20c   : > { %757 = vadd.xlane.f32.xlu1 %v756_v23  ;;  %v2050_v24 = vpop.f32.mrf.mxu1 }
 0x20e   : > { %v750_v25 = vpop.f32.mrf.mxu1 }
 0x210   : > { %v2051_v26 = vpop.f32.mrf.mxu1 }
 0x295   : > { %v758_v27 = vpop.xlane.xlu1 %757 }
 0x296   : > { %v760_v28 = vmul.f32 0.03125, %v758_v27 }
 0x298   : > { %v761_v29 = vsub.f32 %v747_v22, %v760_v28 }
 0x29a   : > { %v762_v30 = vmul.f32 %v761_v29, %v761_v29 }
 0x29c   : > { %v763_v31 = vsel %vm755_vm3, %v762_v30, 0.0 }
 0x29d   : > { %764 = vadd.xlane.f32.xlu1 %v763_v31 }
 0x326   : > { %v765_v32 = vpop.xlane.xlu1 %764 }
 0x327   : > { %v766_v33 = vmul.f32 0.03125, %v765_v32 }
 0x329   : > { %v767_v34 = vadd.f32 1e-05, %v766_v33 }
 0x32b   : > { %2212 = vrsqrt.f32 %v767_v34 }
 0x338   : > { %v2213_v35 = vpop.eup %2212 }
 0x339   : > { %v769_v37 = vmul.f32 %v2213_v35, %v761_v29 }
 0x33b   : > { %v776_v39 = vmul.f32 %v1947_v36, %v769_v37 }
 0x33d   : > { %v783_v40 = vadd.f32 %v1948_v38, %v776_v39 }
 0x33f   : > { %v785_v42 = vrot.slane %v783_v40, 7 }
 0x341   : > { %v788_v43 = vsel %vm787_vm4, 0.0, %v785_v42 }
 0x342   : > { %v2411_v44 = vadd.f32 %v788_v43, %v644_v41 }
 0x344   : > { %v793_v45 = vsel %vm792_vm5, %v2411_v44, 0.0 }
 0x345   : > { %794 = vadd.xlane.f32.xlu0 %v793_v45 }
 0x3ce   : > { %v795_v46 = vpop.xlane.xlu0 %794 }
 0x3cf   : > { %v796_v47 = vmul.f32 0.03125, %v795_v46 }
 0x3d1   : > { %v797_v48 = vsub.f32 %v2411_v44, %v796_v47 }
 0x3d3   : > { %v798_v49 = vmul.f32 %v797_v48, %v797_v48 }
 0x3d5   : > { %v799_v50 = vsel %vm792_vm5, %v798_v49, 0.0 }
 0x3d6   : > { %800 = vadd.xlane.f32.xlu1 %v799_v50 }
 0x45f   : > { %v801_v55 = vpop.xlane.xlu1 %800 }
 0x460   : > { %v802_v56 = vmul.f32 0.03125, %v801_v55 }
 0x462   : > { %v803_v57 = vadd.f32 1e-05, %v802_v56  ;;  %v833_v56 = vld [vmem:[%s2654_s12 + $0x4] sm:$0xf] }
 0x464   : > { %2214 = vrsqrt.f32 %v803_v57  ;;  %v1234_v57 = vsel %vm1232_vm12, %v833_v56, 0 }
 0x471   : > { %v2215_v58 = vpop.eup %2214 }
 0x472   : > { %v805_v60 = vmul.f32 %v2215_v58, %v797_v48 }
 0x474   : > { %v812_v62 = vmul.f32 %v1949_v59, %v805_v60  ;;  %v832_v60 = vld [vmem:[%s2654_s12] sm:$0xf] }
 0x476   : > { %v819_v63 = vadd.f32 %v1950_v61, %v812_v62 }
 0x478   : > { %v837_v1 = vpack.c.bf16 %v819_v63, %v819_v63  ;;  %v1280_v63 = vsel %vm1232_vm12, %v832_v60, 0 }
 0x47a   : > { %2057 = vmatmul.mubr.msk.bf16.vlgmr.msra.gmra.mxu1 %vm850_vm6, %v837_v1  ;;  %2073 = vmatmul.mubr.msk.bf16.vlgmr.msra.gmra.mxu0 %vm850_vm6, %v837_v1 }
 0x47b   : > { %2061 = vmatpush3.bf16.msra.mxu1 %v2198_v0  ;;  %2064 = vmatprep.mubr.msk.bf16.mxu1 %vm2245_vm1, %v2244_v8 }
 0x47c   : > { %2062 = vmatprep.subr.bf16.mxu1 %v2244_v8  ;;  %2084 = vmatprep.mubr.msk.bf16.mxu0 %vm2245_vm1, %v2244_v8 }
 0x47f   : > { %2063 = vmatpush3.bf16.msra.mxu1 %v2199_v2 }
 0x480   : > { %2076 = vmatprep.subr.bf16.mxu1 %v2244_v8 }
 0x482   : > { %2065 = vmatmul.mubr.msk.bf16.vlgmr.msra.gmra.mxu1 %vm850_vm6, %v837_v1 }
 0x483   : > { %2078 = vmatprep.mubr.msk.bf16.mxu1 %vm2245_vm1, %v2244_v8 }
 0x53a   : > { %v888_v5 = vpop.f32.mrf.mxu1  ;;  %v994_v6 = vpop.f32.mrf.mxu0 }
 0x53b   : > { %v2458_v9 = vpack.c.bf16 %v888_v5, %v888_v5  ;;  %v2460_v10 = vpack.c.bf16 %v994_v6, %v994_v6 }
 0x53c   : > { %v2058_v11 = vpop.f32.mrf.mxu1  ;;  %v2074_v12 = vpop.f32.mrf.mxu0 }
 0x53d   : > { %1115 = vrot.lane.b32.xlu1 %v2458_v9, %s2247_s0  ;;  %v1071_v13 = vand.u32 %v2456_v7, %v2460_v10 }
 0x53e   : > { %v891_v14 = vpop.f32.mrf.mxu1  ;;  %v997_v15 = vpop.f32.mrf.mxu0 }
 0x53f   : > { %2083 = vmatpush3.bf16.msra.mxu0 %v1071_v13 }
 0x540   : > { %v2059_v16 = vpop.f32.mrf.mxu1  ;;  %v2075_v17 = vpop.f32.mrf.mxu0  ;;  %2094 = vmatprep.subr.bf16.mxu0 %v2244_v8 }
 0x542   : > { %v941_v18 = vpop.f32.mrf.mxu1 }
 0x543   : > { %v2467_v19 = vpack.c.bf16 %v941_v18, %v941_v18 }
 0x544   : > { %v2066_v20 = vpop.f32.mrf.mxu1 }
 0x545   : > { %1118 = vrot.lane.b32.xlu0 %v2467_v19, %s2247_s0  ;;  %v1006_v21 = vsel %vm1001_vm9, %v2467_v19, 0 }
 0x546   : > { %v944_v22 = vpop.f32.mrf.mxu1  ;;  %2077 = vmatpush3.bf16.xpose.msra.mxu1 %v1006_v21 }
 0x547   : > { %2088 = vmatprep.subr.bf16.mxu1 %v2244_v8 }
 0x548   : > { %v2067_v23 = vpop.f32.mrf.mxu1 }
 0x54d   : > { %2079 = vmatmul.mubr.msk.bf16.vlgmr.msra.gmra.mxu1 %vm1001_vm9, %v2458_v9 }
 0x54e   : > { %2090 = vmatprep.mubr.msk.bf16.mxu1 %vm2245_vm1, %v2244_v8 }
 0x5af   : > { %v1116_v26 = vpop.permute.xlu1 %1115 }
 0x5b7   : > { %v1119_v24 = vpop.permute.xlu0 %1118 }
 0x5b8   : > { %v1124_v25 = vsel %vm1001_vm9, %v1119_v24, 0 }
 0x5b9   : > { %2089 = vmatpush3.bf16.xpose.msra.mxu1 %v1124_v25 }
 0x5ba   : > { %2100 = vmatprep.subr.bf16.mxu1 %v2244_v8 }
 0x5c0   : > { %2091 = vmatmul.mubr.msk.bf16.vlgmr.msra.gmra.mxu1 %vm1001_vm9, %v1116_v26 }
 0x5c1   : > { %2102 = vmatprep.mubr.msk.bf16.mxu1 %vm2245_vm1, %v2244_v8  ;;  %2101 = vmatpush3.bf16.msra.mxu1 %v1234_v57 }
 0x5c2   : > { %2112 = vmatprep.subr.bf16.mxu1 %v2244_v8 }
 0x60d   : > { %v1042_v27 = vpop.f32.mrf.mxu1 }
 0x60e   : > { %v1048_v28 = vmul.f32 0.35355338, %v1042_v27 }
 0x60f   : > { %v2080_v29 = vpop.f32.mrf.mxu1 }
 0x610   : > { %v1050_v30 = vsel %vm1049_vm10, %v1048_v28, -inf }
 0x611   : > { %1051 = vmax.xlane.f32.xlu1 %v1050_v30  ;;  %v1045_v31 = vpop.f32.mrf.mxu1 }
 0x613   : > { %v2081_v32 = vpop.f32.mrf.mxu1 }
 0x680   : > { %v1160_v33 = vpop.f32.mrf.mxu1 }
 0x681   : > { %v1166_v34 = vmul.f32 0.35355338, %v1160_v33 }
 0x682   : > { %v2092_v35 = vpop.f32.mrf.mxu1 }
 0x683   : > { %v1167_v36 = vsel %vm1049_vm10, %v1166_v34, -inf }
 0x684   : > { %1168 = vmax.xlane.f32.xlu0 %v1167_v36  ;;  %v1163_v37 = vpop.f32.mrf.mxu1 }
 0x686   : > { %v2093_v38 = vpop.f32.mrf.mxu1 }
 0x69a   : > { %v1052_v39 = vpop.xlane.xlu1 %1051 }
 0x69b   : > { %v1053_v40 = vsub.f32 %v1048_v28, %v1052_v39 }
 0x69d   : > { %v1054_v41 = vmul.f32 1.442695, %v1053_v40 }
 0x69f   : > { %2216 = vpow2.f32 %v1054_v41 }
 0x6ac   : > { %v2217_v42 = vpop.eup %2216 }
 0x6ad   : > { %v1056_v43 = vsel %vm1049_vm10, %v2217_v42, 0.0 }
 0x6ae   : > { %1057 = vadd.xlane.f32.xlu0 %v1056_v43 }
 0x6c4   : > { %1180 = vrot.lane.b32.xlu0 %v2460_v10, %s2247_s0 }
 0x70d   : > { %v1169_v45 = vpop.xlane.xlu0 %1168 }
 0x70e   : > { %v1170_v46 = vsub.f32 %v1166_v34, %v1169_v45  ;;  %v834_v45 = vld [vmem:[%s2654_s12 + $0x8] sm:$0xf] }
 0x710   : > { %v1171_v47 = vmul.f32 1.442695, %v1170_v46  ;;  %v1438_v46 = vsel %vm1232_vm12, %v834_v45, 0  ;;  %v2202_v45 = vld [vmem:[%s2660_s18 + $0x38] sm:$0xff]  }
 0x712   : > { %2218 = vpow2.f32 %v1171_v47 }
 0x71f   : > { %v2219_v48 = vpop.eup %2218 }
 0x720   : > { %v1173_v49 = vsel %vm1049_vm10, %v2219_v48, 0.0 }
 0x721   : > { %1174 = vadd.xlane.f32.xlu1 %v1173_v49 }
 0x732   : > { %1324 = vrot.lane.b32.xlu1 %v2467_v19, %s2248_s21 }
 0x736   : > { %1322 = vrot.lane.b32.xlu1 %v2458_v9, %s2248_s21 }
 0x737   : > { %v1058_v50 = vpop.xlane.xlu0 %1057 }
 0x738   : > { %2220 = vrcp.f32 %v1058_v50 }
 0x73b   : > { %v1181_v52 = vpop.permute.xlu0 %1180 }
 0x73c   : > { %v1186_v55 = vand.u32 %v1181_v52, %v2456_v7 }
 0x745   : > { %v2221_v51 = vpop.eup %2220 }
 0x746   : > { %v1060_v53 = vmul.f32 %v2221_v51, %v2217_v42 }
 0x748   : > { %v1061_v54 = vpack.c.bf16 %v1060_v53, %v1060_v53 }
 0x74a   : > { %2085 = vmatmul.mubr.msk.bf16.vlgmr.msra.gmra.mxu0 %vm1062_vm11, %v1061_v54 }
 0x74b   : > { %2095 = vmatpush3.bf16.msra.mxu0 %v1186_v55  ;;  %2096 = vmatprep.mubr.msk.bf16.mxu0 %vm2245_vm1, %v2244_v8 }
 0x74c   : > { %2106 = vmatprep.subr.bf16.mxu0 %v2244_v8 }
 0x7aa   : > { %v1175_v58 = vpop.xlane.xlu1 %1174 }
 0x7ab   : > { %2222 = vrcp.f32 %v1175_v58 }
 0x7ae   : > { %v1325_v5 = vpop.permute.xlu1 %1324 }
 0x7af   : > { %v1330_v13 = vsel %vm1001_vm9, %v1325_v5, 0 }
 0x7b2   : > { %v1323_v16 = vpop.permute.xlu1 %1322 }
 0x7b8   : > { %v2223_v59 = vpop.eup %2222 }
 0x7b9   : > { %v1177_v61 = vmul.f32 %v2223_v59, %v2219_v48 }
 0x7bb   : > { %v1178_v62 = vpack.c.bf16 %v1177_v61, %v1177_v61 }
 0x7bd   : > { %2097 = vmatmul.mubr.msk.bf16.vlgmr.msra.gmra.mxu0 %vm1062_vm11, %v1178_v62 }
 0x7be   : > { %2107 = vmatpush3.bf16.msra.mxu0 %v1280_v63  ;;  %2108 = vmatprep.mubr.msk.bf16.mxu0 %vm2245_vm1, %v2244_v8 }
 0x7bf   : > { %2118 = vmatprep.subr.bf16.mxu0 %v2244_v8 }
 0x80a   : > { %v1107_v0 = vpop.f32.mrf.mxu0 }
 0x80b   : > { %v1113_v1 = vpack.c.bf16 %v1107_v0, %v1107_v0 }
 0x80c   : > { %v2086_v2 = vpop.f32.mrf.mxu0 }
 0x80d   : > { %2109 = vmatmul.mubr.msk.bf16.vlgmr.msra.gmra.mxu0 %vm1001_vm9, %v1113_v1 }
 0x80e   : > { %v1110_v3 = vpop.f32.mrf.mxu0  ;;  %2120 = vmatprep.mubr.msk.bf16.mxu0 %vm2245_vm1, %v2244_v8 }
 0x810   : > { %v2087_v4 = vpop.f32.mrf.mxu0 }
 0x811   : > { %v835_v4 = vld [vmem:[%s2654_s12 + $0xc] sm:$0xf] }
 0x812   : > { %v1597_v5 = vsel %vm1232_vm12, %v835_v4, 0 }
 0x87d   : > { %v1222_v6 = vpop.f32.mrf.mxu0 }
 0x87e   : > { %v1228_v11 = vpack.c.bf16 %v1222_v6, %v1222_v6 }
 0x87f   : > { %v2098_v12 = vpop.f32.mrf.mxu0 }
 0x880   : > { %2103 = vmatmul.mubr.msk.bf16.vlgmr.msra.gmra.mxu1 %vm1001_vm9, %v1228_v11 }
 0x881   : > { %2113 = vmatpush3.bf16.xpose.msra.mxu1 %v1330_v13  ;;  %v1225_v14 = vpop.f32.mrf.mxu0  ;;  %2114 = vmatprep.mubr.msk.bf16.mxu1 %vm2245_vm1, %v2244_v8 }
 0x882   : > { %2124 = vmatprep.subr.bf16.mxu1 %v2244_v8 }
 0x883   : > { %v2099_v15 = vpop.f32.mrf.mxu0 }
 0x888   : > { %2115 = vmatmul.mubr.msk.bf16.vlgmr.msra.gmra.mxu1 %vm1001_vm9, %v1323_v16 }
 0x889   : > { %2126 = vmatprep.mubr.msk.bf16.mxu1 %vm2245_vm1, %v2244_v8  ;;  %2125 = vmatpush3.bf16.msra.mxu1 %v1438_v46  ;;  %v2203_v46 = vld [vmem:[%s2660_s18 + $0x30] sm:$0xff]  }
 0x88a   : > { %2136 = vmatprep.subr.bf16.mxu1 %v2244_v8 }
 0x8cd   : > { %v2522_v17 = vpop.f32.mrf.mxu0 }
 0x8cf   : > { %v2110_v18 = vpop.f32.mrf.mxu0 }
 0x8d1   : > { %v1319_v20 = vpop.f32.mrf.mxu0 }
 0x8d3   : > { %v2111_v21 = vpop.f32.mrf.mxu0 }
 0x8d4   : > { %v1972_v21 = vld [vmem:[%s2655_s13] ss:$0 sm:$0xff] }
 0x940   : > { %v2524_v22 = vpop.f32.mrf.mxu1 }
 0x941   : > { %v1317_v1 = vadd.f32 %v2522_v17, %v2524_v22 }
 0x942   : > { %v2104_v23 = vpop.f32.mrf.mxu1 }
 0x944   : > { %v1273_v24 = vpop.f32.mrf.mxu1 }
 0x946   : > { %v2105_v25 = vpop.f32.mrf.mxu1 }
 0x948   : > { %v1366_v26 = vpop.f32.mrf.mxu1 }
 0x949   : > { %v1372_v27 = vmul.f32 0.35355338, %v1366_v26 }
 0x94a   : > { %v2116_v28 = vpop.f32.mrf.mxu1 }
 0x94b   : > { %v1373_v29 = vsel %vm1049_vm10, %v1372_v27, -inf }
 0x94c   : > { %1374 = vmax.xlane.f32.xlu1 %v1373_v29  ;;  %v1369_v30 = vpop.f32.mrf.mxu1 }
 0x94e   : > { %v2117_v31 = vpop.f32.mrf.mxu1 }
 0x95d   : > { %1483 = vrot.lane.b32.xlu1 %v2467_v19, %s2249_s3 }
 0x961   : > { %1481 = vrot.lane.b32.xlu1 %v2458_v9, %s2249_s3 }
 0x9d5   : > { %v1375_v32 = vpop.xlane.xlu1 %1374 }
 0x9d6   : > { %v1376_v33 = vsub.f32 %v1372_v27, %v1375_v32 }
 0x9d8   : > { %v1377_v34 = vmul.f32 1.442695, %v1376_v33 }
 0x9d9   : > { %v1484_v40 = vpop.permute.xlu1 %1483 }
 0x9da   : > { %2224 = vpow2.f32 %v1377_v34  ;;  %v1489_v42 = vsel %vm1001_vm9, %v1484_v40, 0  ;;  %v1974_v40 = vld [vmem:[%s2657_s15] ss:$0 sm:$0xff] }
 0x9dd   : > { %v1482_v43 = vpop.permute.xlu1 %1481 }
 0x9e7   : > { %v2225_v35 = vpop.eup %2224 }
 0x9e8   : > { %v1379_v36 = vsel %vm1049_vm10, %v2225_v35, 0.0 }
 0x9e9   : > { %1380 = vadd.xlane.f32.xlu0 %v1379_v36 }
 0x9ff   : > { %1385 = vrot.lane.b32.xlu0 %v2460_v10, %s2248_s21 }
 0xa72   : > { %v1381_v37 = vpop.xlane.xlu0 %1380 }
 0xa73   : > { %2226 = vrcp.f32 %v1381_v37 }
 0xa76   : > { %v1386_v38 = vpop.permute.xlu0 %1385 }
 0xa77   : > { %v1391_v39 = vand.u32 %v1386_v38, %v2456_v7 }
 0xa79   : > { %2119 = vmatpush3.bf16.msra.mxu0 %v1391_v39 }
 0xa7a   : > { %2130 = vmatprep.subr.bf16.mxu0 %v2244_v8 }
 0xa80   : > { %v2227_v9 = vpop.eup %2226 }
 0xa81   : > { %v1383_v19 = vmul.f32 %v2227_v9, %v2225_v35  ;;  %v2200_v35 = vld [vmem:[%s2658_s16 + $0x8] sm:$0xff]   ;;  %v1973_v9 = vld [vmem:[%s2656_s14] ss:$0 sm:$0xff] }
 0xa83   : > { %v1384_v41 = vpack.c.bf16 %v1383_v19, %v1383_v19 }
 0xa85   : > { %2121 = vmatmul.mubr.msk.bf16.vlgmr.msra.gmra.mxu0 %vm1062_vm11, %v1384_v41 }
 0xa86   : > { %2131 = vmatpush3.bf16.xpose.msra.mxu0 %v1489_v42  ;;  %2132 = vmatprep.mubr.msk.bf16.mxu0 %vm2245_vm1, %v2244_v8 }
 0xa87   : > { %2142 = vmatprep.subr.bf16.mxu0 %v2244_v8 }
 0xa8d   : > { %2133 = vmatmul.mubr.msk.bf16.vlgmr.msra.gmra.mxu0 %vm1001_vm9, %v1482_v43 }
 0xa8e   : > { %2144 = vmatprep.mubr.msk.bf16.mxu0 %vm2245_vm1, %v2244_v8  ;;  %2143 = vmatpush3.bf16.msra.mxu0 %v1597_v5 }
 0xa8f   : > { %2156 = vmatprep.subr.bf16.mxu0 %v2244_v8 }
 0xb45   : > { %v1427_v47 = vpop.f32.mrf.mxu0 }
 0xb46   : > { %v1433_v48 = vpack.c.bf16 %v1427_v47, %v1427_v47  ;;  %v2204_v47 = vld [vmem:[%s2660_s18 + $0x28] sm:$0xff]  }
 0xb47   : > { %v2122_v49 = vpop.f32.mrf.mxu0 }
 0xb48   : > { %2127 = vmatmul.mubr.msk.bf16.vlgmr.msra.gmra.mxu1 %vm1001_vm9, %v1433_v48  ;;  %v2205_v48 = vld [vmem:[%s2660_s18 + $0x20] sm:$0xff]   ;;  %v2206_v49 = vld [vmem:[%s2660_s18 + $0x18] sm:$0xff]  }
 0xb49   : > { %v1430_v50 = vpop.f32.mrf.mxu0  ;;  %2138 = vmatprep.mubr.msk.bf16.mxu1 %vm2245_vm1, %v2244_v8 }
 0xb4a   : > { %v2207_v50 = vld [vmem:[%s2660_s18 + $0x10] sm:$0xff]  }
 0xb4b   : > { %v2123_v51 = vpop.f32.mrf.mxu0 }
 0xb4c   : > { %v2208_v51 = vld [vmem:[%s2660_s18 + $0x8] sm:$0xff]  }
 0xb4d   : > { %v1525_v52 = vpop.f32.mrf.mxu0 }
 0xb4e   : > { %v1531_v53 = vmul.f32 0.35355338, %v1525_v52  ;;  %v2209_v52 = vld [vmem:[%s2660_s18] sm:$0xff]  }
 0xb4f   : > { %v2134_v54 = vpop.f32.mrf.mxu0 }
 0xb50   : > { %v1532_v55 = vsel %vm1049_vm10, %v1531_v53, -inf }
 0xb51   : > { %1533 = vmax.xlane.f32.xlu0 %v1532_v55  ;;  %v1528_v56 = vpop.f32.mrf.mxu0 }
 0xb53   : > { %v2135_v57 = vpop.f32.mrf.mxu0 }
 0xb67   : > { %1544 = vrot.lane.b32.xlu0 %v2460_v10, %s2249_s3 }
 0xbda   : > { %v1534_v58 = vpop.xlane.xlu0 %1533 }
 0xbdb   : > { %v1535_v59 = vsub.f32 %v1531_v53, %v1534_v58  ;;  %v1975_v53 = vld [vmem:[%s2659_s17] ss:$0 sm:$0xff] }
 0xbdd   : > { %v1536_v60 = vmul.f32 1.442695, %v1535_v59 }
 0xbde   : > { %v1545_v61 = vpop.permute.xlu0 %1544 }
 0xbdf   : > { %2228 = vpow2.f32 %v1536_v60  ;;  %v1550_v62 = vand.u32 %v1545_v61, %v2456_v7 }
 0xbe1   : > { %2137 = vmatpush3.bf16.msra.mxu1 %v1550_v62 }
 0xbe2   : > { %2148 = vmatprep.subr.bf16.mxu1 %v2244_v8 }
 0xbec   : > { %v2229_v63 = vpop.eup %2228 }
 0xbed   : > { %v1538_v0 = vsel %vm1049_vm10, %v2229_v63, 0.0 }
 0xbee   : > { %1539 = vadd.xlane.f32.xlu1 %v1538_v0 }
 0xc08   : > { %v1474_v2 = vpop.f32.mrf.mxu1 }
 0xc09   : > { %v1480_v3 = vadd.f32 %v1474_v2, %v1317_v1 }
 0xc0a   : > { %v2128_v10 = vpop.f32.mrf.mxu1 }
 0xc0b   : > { %v1979_v10 = vld [vmem:[%s2661_s19] ss:$0 sm:$0xff] }
 0xc0c   : > { %v1477_v7 = vpop.f32.mrf.mxu1 }
 0xc0e   : > { %v2129_v6 = vpop.f32.mrf.mxu1 }
 0xc77   : > { %v1540_v11 = vpop.xlane.xlu1 %1539 }
 0xc78   : > { %2230 = vrcp.f32 %v1540_v11 }
 0xc85   : > { %v2231_v12 = vpop.eup %2230 }
 0xc86   : > { %v1542_v13 = vmul.f32 %v2231_v12, %v2229_v63 }
 0xc88   : > { %v1543_v14 = vpack.c.bf16 %v1542_v13, %v1542_v13 }
 0xc8a   : > { %2139 = vmatmul.mubr.msk.bf16.vlgmr.msra.gmra.mxu1 %vm1062_vm11, %v1543_v14 }
 0xc8b   : > { %2152 = vmatprep.mubr.msk.bf16.mxu1 %vm2245_vm1, %v2244_v8  ;;  %2149 = vmatpush3.bf16.msra.mxu1 %v2200_v35 }
 0xc8c   : > { %2150 = vmatprep.subr.bf16.mxu1 %v2244_v8 }
 0xd4a   : > { %v1586_v15 = vpop.f32.mrf.mxu1 }
 0xd4b   : > { %v1592_v16 = vpack.c.bf16 %v1586_v15, %v1586_v15 }
 0xd4c   : > { %v2140_v17 = vpop.f32.mrf.mxu1 }
 0xd4d   : > { %2145 = vmatmul.mubr.msk.bf16.vlgmr.msra.gmra.mxu0 %vm1001_vm9, %v1592_v16 }
 0xd4e   : > { %v1589_v18 = vpop.f32.mrf.mxu1  ;;  %2172 = vmatprep.mubr.msk.bf16.mxu0 %vm2245_vm1, %v2244_v8  ;;  %2157 = vmatpush3.bf16.msra.mxu0 %v2202_v45 }
 0xd4f   : > { %2158 = vmatprep.subr.bf16.mxu0 %v2244_v8 }
 0xd50   : > { %v2141_v20 = vpop.f32.mrf.mxu1 }
 0xd52   : > { %2159 = vmatpush3.bf16.msra.mxu0 %v2203_v46 }
 0xd53   : > { %2160 = vmatprep.subr.bf16.mxu0 %v2244_v8 }
 0xd56   : > { %2161 = vmatpush3.bf16.msra.mxu0 %v2204_v47 }
 0xd57   : > { %2162 = vmatprep.subr.bf16.mxu0 %v2244_v8 }
 0xd5a   : > { %2163 = vmatpush3.bf16.msra.mxu0 %v2205_v48 }
 0xd5b   : > { %2164 = vmatprep.subr.bf16.mxu0 %v2244_v8 }
 0xd5e   : > { %2165 = vmatpush3.bf16.msra.mxu0 %v2206_v49 }
 0xd5f   : > { %2166 = vmatprep.subr.bf16.mxu0 %v2244_v8 }
 0xd62   : > { %2167 = vmatpush3.bf16.msra.mxu0 %v2207_v50 }
 0xd63   : > { %2168 = vmatprep.subr.bf16.mxu0 %v2244_v8 }
 0xd66   : > { %2169 = vmatpush3.bf16.msra.mxu0 %v2208_v51 }
 0xd67   : > { %2170 = vmatprep.subr.bf16.mxu0 %v2244_v8 }
 0xd6a   : > { %2171 = vmatpush3.bf16.msra.mxu0 %v2209_v52 }
 0xe0d   : > { %v1633_v22 = vpop.f32.mrf.mxu0 }
 0xe0e   : > { %v1639_v23 = vadd.f32 %v1633_v22, %v1480_v3 }
 0xe0f   : > { %v2146_v24 = vpop.f32.mrf.mxu0 }
 0xe10   : > { %v1646_v25 = vadd.f32 %v1972_v21, %v1639_v23 }
 0xe11   : > { %v1636_v26 = vpop.f32.mrf.mxu0 }
 0xe12   : > { %v2575_v27 = vadd.f32 %v1646_v25, %v2411_v44  ;;  %v2201_v44 = vld [vmem:[%s2658_s16] sm:$0xff]  }
 0xe13   : > { %v2147_v28 = vpop.f32.mrf.mxu0  ;;  %2151 = vmatpush3.bf16.msra.mxu1 %v2201_v44 }
 0xe14   : > { %v1650_v29 = vsel %vm792_vm5, %v2575_v27, 0.0 }
 0xe15   : > { %1651 = vadd.xlane.f32.xlu1 %v1650_v29 }
 0xe9e   : > { %v1652_v30 = vpop.xlane.xlu1 %1651 }
 0xe9f   : > { %v1653_v31 = vmul.f32 0.03125, %v1652_v30 }
 0xea1   : > { %v1654_v32 = vsub.f32 %v2575_v27, %v1653_v31 }
 0xea3   : > { %v1655_v33 = vmul.f32 %v1654_v32, %v1654_v32 }
 0xea5   : > { %v1656_v34 = vsel %vm792_vm5, %v1655_v33, 0.0 }
 0xea6   : > { %1657 = vadd.xlane.f32.xlu1 %v1656_v34 }
 0xf2f   : > { %v1658_v36 = vpop.xlane.xlu1 %1657 }
 0xf30   : > { %v1659_v37 = vmul.f32 0.03125, %v1658_v36 }
 0xf32   : > { %v1660_v38 = vadd.f32 1e-05, %v1659_v37 }
 0xf34   : > { %2232 = vrsqrt.f32 %v1660_v38 }
 0xf41   : > { %v2233_v39 = vpop.eup %2232 }
 0xf42   : > { %v1662_v19 = vmul.f32 %v2233_v39, %v1654_v32 }
 0xf44   : > { %v1669_v41 = vmul.f32 %v1973_v9, %v1662_v19 }
 0xf46   : > { %v1676_v42 = vadd.f32 %v1974_v40, %v1669_v41 }
 0xf48   : > { %v1699_v43 = vpack.c.bf16 %v1676_v42, %v1676_v42 }
 0xf4a   : > { %2153 = vmatmul.mubr.msk.bf16.vlgmr.msra.gmra.mxu1 %vm850_vm6, %v1699_v43 }
0x100a   : > { %v1755_v54 = vpop.f32.mrf.mxu1 }
0x100b   : > { %v1756_v55 = vadd.f32 %v1975_v53, %v1755_v54 }
0x100c   : > { %v2154_v56 = vpop.f32.mrf.mxu1 }
0x100d   : > { %v1762_v57 = vmul.f32 0.044715, %v1756_v55  ;;  %v1761_v1 = vmul.f32 0.5, %v1756_v55 }
0x100e   : > { %v1758_v58 = vpop.f32.mrf.mxu1 }
0x100f   : > { %v1763_v59 = vmul.f32 %v1762_v57, %v1756_v55 }
0x1010   : > { %v2155_v60 = vpop.f32.mrf.mxu1 }
0x1011   : > { %v1764_v61 = vmul.f32 %v1763_v59, %v1756_v55 }
0x1013   : > { %v1765_v62 = vadd.f32 %v1764_v61, %v1756_v55 }
0x1015   : > { %v1766_v63 = vmul.f32 0.7978846, %v1765_v62 }
0x1017   : > { %2234 = vtanh.f32 %v1766_v63 }
0x1024   : > { %v2235_v0 = vpop.eup %2234 }
0x1025   : > { %v1768_v8 = vadd.f32 1.0, %v2235_v0 }
0x1027   : > { %v1769_v2 = vmul.f32 %v1768_v8, %v1761_v1 }
0x1029   : > { %v1770_v3 = vpack.c.bf16 %v1769_v2, %v1769_v2 }
0x102b   : > { %2173 = vmatmul.mubr.bf16.vlgmr.msra.gmra.mxu0 %v1770_v3 }
0x10eb   : > { %v1859_v4 = vpop.f32.mrf.mxu0 }
0x10ec   : > { %v1860_v5 = vadd.f32 %v1979_v10, %v1859_v4 }
0x10ed   : > { %v2174_v7 = vpop.f32.mrf.mxu0 }
0x10ee   : > { %v1865_v6 = vadd.f32 %v1860_v5, %v2575_v27 }
0x10ef   : > { %v1862_v11 = vpop.f32.mrf.mxu0 }
0x10f0   : > { %1866 = vst.msk [vmem:[%s641_s29] sm:$0x1f] %vm792_vm5, %v1865_v6 }
0x10f1   : > { %v2175_v12 = vpop.f32.mrf.mxu0 }
0x10f2 PF: > { %s30_s1 = sadd.s32 1, %s2242_s1  }
0x10f3   : > { %p27_p4 = scmp.ge.s32.totalorder %s30_s1, 4  }
0x10f5   :  { %29 = sbr.rel (!%p27_p4) target bundleno = 6 (0x6), region = 133 }

</bundles_post_ra>
